<compile_context>
chip_gen: v7x
topology: tpu7x:2x2x1
jax: 0.10.0
libtpu: 0.0.40
codegen_flags: <defaults>
</compile_context>

<pallas_src>
import jax
import jax.numpy as jnp
import numpy as np
from jax import lax
from jax.experimental import pallas as pl
from jax.experimental.pallas import tpu as pltpu

EPS = 1e-5
LANE = 128


def _round_up(v, m):
    return (v + m - 1) // m * m


def _vmem_limit_bytes():
    # Generation-aware budget: ~75% of per-core VMEM, capped at 100 MiB.
    # v5e/v6e: 128 MiB/core -> 96 MiB ; v7x: 64 MiB/TC -> 48 MiB.
    try:
        cap = int(pltpu.get_tpu_info().vmem_capacity_bytes)
    except Exception:
        cap = 64 * 1024 * 1024
    return int(min(cap * 3 // 4, 100 * 1024 * 1024))


# --------------------------- in-kernel helpers ------------------------------ #

def _fill_flat_pad(pad_ref, act_bf16, wp):
    # pad_ref: ((H+2)*wp + 8, C) bf16, flattened row-major padded image.
    # act_bf16: (H, W, C) post-bn-relu activation (already bf16: single cast).
    h, w, c = act_bf16.shape
    zl = jnp.zeros((h, 1, c), jnp.bfloat16)
    zr = jnp.zeros((h, wp - w - 1, c), jnp.bfloat16)
    aw = jnp.concatenate([zl, act_bf16, zr], axis=1)                    # (H, wp, C)
    # halo-only zeroing, every step (megacore-safe; interior fully overwritten per step)
    pad_ref[pl.ds(0, wp), :] = jnp.zeros((wp, c), jnp.bfloat16)         # top halo row
    pad_ref[pl.ds(wp, h * wp), :] = aw.reshape(h * wp, c)               # interior (+ L/R halo)
    pad_ref[pl.ds((h + 1) * wp, wp + 8), :] = jnp.zeros((wp + 8, c), jnp.bfloat16)  # bottom + guard


def _conv3x3_from_flat(pad_ref, w_ref, m, wp):
    # 9 shifted contiguous-row matmuls over the flattened padded activation.
    # Wide output row g = i*wp + q ; tap (dh, dw) reads flat row g + dh*wp + dw.
    acc = None
    for dh in range(3):
        for dw in range(3):
            lhs = pad_ref[pl.ds(dh * wp + dw, m), :]                    # (m, C) bf16, contiguous
            part = jnp.dot(lhs, w_ref[dh, dw], preferred_element_type=jnp.float32)
            acc = part if acc is None else acc + part
    return acc                                                          # (m, Co) f32


# ----------------------------- Pallas kernels ------------------------------ #

def _make_conv1_s1_kernel(emit_proj, wp):
    # bn1 + relu1 + conv1 (stride 1) fused; bn2 partial stats; optional 1x1 shortcut proj.
    def kernel(*refs):
        if emit_proj:
            (x_ref, sc1_ref, sh1_ref, w_ref, wsc_ref,
             o_ref, st_ref, sc_ref, pad_ref) = refs
        else:
            x_ref, sc1_ref, sh1_ref, w_ref, o_ref, st_ref, pad_ref = refs
        _, h, w, cip = x_ref.shape
        cop = w_ref.shape[3]
        xv = x_ref[0]
        act = jnp.maximum(xv * sc1_ref[...] + sh1_ref[...], 0.0)        # f32 bn+relu
        _fill_flat_pad(pad_ref, act.astype(jnp.bfloat16), wp)           # single cast
        acc = _conv3x3_from_flat(pad_ref, w_ref, h * wp, wp)            # (h*wp, cop) f32
        y = acc.reshape(h, wp, cop)[:, :w, :]                           # drop wide columns
        o_ref[0] = y.astype(o_ref.dtype)                                # bf16 inter-pass buffer
        yf = y.reshape(h * w, cop)
        st_ref[0, 0:1, :] = jnp.sum(yf, axis=0, keepdims=True)
        st_ref[0, 1:2, :] = jnp.sum(yf * yf, axis=0, keepdims=True)
        if emit_proj:                                                   # shortcut while x in VMEM
            xs = xv.reshape(h * w, cip).astype(jnp.bfloat16)
            sc_ref[0] = jnp.dot(xs, wsc_ref[...],
                                preferred_element_type=jnp.float32).reshape(h, w, cop)
    return kernel


def _make_conv1_s2_kernel(wq):
    # bn1 + relu1 + conv1 (stride 2): W-packed / H-parity-split flattened layout so every tap
    # is a contiguous-row, lane-aligned slice; bn2 partial stats; 1x1 stride-2 shortcut proj.
    def kernel(x_ref, sc1_ref, sh1_ref, w_ref, wsc_ref,
               o_ref, st_ref, sc_ref, pad0_ref, pad1_ref):
        _, h, w2, c2 = x_ref.shape
        cip = c2 // 2
        cop = w_ref.shape[3]
        h2 = h // 2
        m = h2 * wq
        xv = x_ref[0]
        act = jnp.maximum(xv * sc1_ref[...] + sh1_ref[...], 0.0)        # (h, w2, 2cip) f32
        act4 = act.reshape(h2, 2, w2, c2)                               # split H parity (free)
        zl = jnp.zeros((h2, 1, c2), jnp.bfloat16)
        zr = jnp.zeros((h2, wq - w2 - 1, c2), jnp.bfloat16)
        aw0 = jnp.concatenate([zl, act4[:, 0].astype(jnp.bfloat16), zr], axis=1)
        aw1 = jnp.concatenate([zl, act4[:, 1].astype(jnp.bfloat16), zr], axis=1)
        # plane 0 holds input rows 2k (bottom halo + guard zeroed each step)
        pad0_ref[pl.ds(0, m), :] = aw0.reshape(m, c2)
        pad0_ref[pl.ds(m, wq + 8), :] = jnp.zeros((wq + 8, c2), jnp.bfloat16)
        # plane 1 holds input rows 2k-1 (top halo row + guard zeroed each step)
        pad1_ref[pl.ds(0, wq), :] = jnp.zeros((wq, c2), jnp.bfloat16)
        pad1_ref[pl.ds(wq, m), :] = aw1.reshape(m, c2)
        pad1_ref[pl.ds(wq + m, 8), :] = jnp.zeros((8, c2), jnp.bfloat16)
        # tap (dh, dw) reads input pixel (2i+dh-1, 2j+dw-1):
        planes = (pad1_ref, pad0_ref, pad1_ref)   # dh -> parity plane
        roff = (0, 0, 1)                          # dh -> padded-row offset inside the plane
        qoff = (0, 1, 1)                          # dw -> packed-column offset
        coff = (cip, 0, cip)                      # dw -> channel half of the packed pair
        acc = None
        for dh in range(3):
            for dw in range(3):
                lhs = planes[dh][pl.ds(roff[dh] * wq + qoff[dw], m),
                                 coff[dw]:coff[dw] + cip]               # (m, cip) bf16
                part = jnp.dot(lhs, w_ref[dh, dw], preferred_element_type=jnp.float32)
                acc = part if acc is None else acc + part
        y = acc.reshape(h2, wq, cop)[:, :w2, :]
        o_ref[0] = y.astype(o_ref.dtype)
        yf = y.reshape(h2 * w2, cop)
        st_ref[0, 0:1, :] = jnp.sum(yf, axis=0, keepdims=True)
        st_ref[0, 1:2, :] = jnp.sum(yf * yf, axis=0, keepdims=True)
        # 1x1 stride-2 shortcut (even rows / even cols) projected while x is in VMEM
        xs = xv.reshape(h2, 2, w2, c2)[:, 0, :, 0:cip]                  # (h2, w2, cip)
        sc_ref[0] = jnp.dot(xs.reshape(h2 * w2, cip).astype(jnp.bfloat16), wsc_ref[...],
                            preferred_element_type=jnp.float32).reshape(h2, w2, cop)
    return kernel


def _make_conv2_add_kernel(wp):
    # bn2 + relu2 + conv2 (stride 1) + shortcut add (identity or precomputed projection).
    def kernel(h_ref, sc2_ref, sh2_ref, w_ref, add_ref, o_ref, pad_ref):
        _, ho, wo, cop = h_ref.shape
        act = jnp.maximum(h_ref[0].astype(jnp.float32) * sc2_ref[...] + sh2_ref[...], 0.0)
        _fill_flat_pad(pad_ref, act.astype(jnp.bfloat16), wp)
        acc = _conv3x3_from_flat(pad_ref, w_ref, ho * wp, wp)
        y = acc.reshape(ho, wp, cop)[:, :wo, :]
        o_ref[0] = y + add_ref[0]                                       # f32 shortcut add
    return kernel


# ------------------------------ call helper -------------------------------- #

def _pcall(kernel, grid, in_specs, out_shape, out_specs, scratch_shapes, *args):
    return pl.pallas_call(
        kernel,
        grid=grid,
        in_specs=in_specs,
        out_specs=out_specs,
        out_shape=out_shape,
        scratch_shapes=scratch_shapes,
        compiler_params=pltpu.CompilerParams(
            dimension_semantics=("parallel",),        # batch grid split across TCs (v7x)
            vmem_limit_bytes=_vmem_limit_bytes()),
    )(*args)


# -------------------------- parameters / forward --------------------------- #

def init_params(key, cin, cout, stride):
    ks = jax.random.split(key, 7)
    p = {
        "g1": 1.0 + 0.1 * jax.random.normal(ks[0], (cin,), jnp.float32),
        "b1": 0.1 * jax.random.normal(ks[1], (cin,), jnp.float32),
        "w1": 0.1 * jax.random.normal(ks[2], (cout, cin, 3, 3), jnp.float32),   # OIHW
        "g2": 1.0 + 0.1 * jax.random.normal(ks[3], (cout,), jnp.float32),
        "b2": 0.1 * jax.random.normal(ks[4], (cout,), jnp.float32),
        "w2": 0.1 * jax.random.normal(ks[5], (cout, cout, 3, 3), jnp.float32),  # OIHW
    }
    if stride != 1 or cin != cout:
        p["wsc"] = 0.1 * jax.random.normal(ks[6], (cout, cin, 1, 1), jnp.float32)
    return p


def residual_block_pallas(x_nchw, params, stride):
    assert stride in (1, 2), "kernels implement the WideResNet strides 1 and 2"
    n, ci, h, w = x_nchw.shape
    co = params["w1"].shape[0]
    if stride == 2:
        assert h % 2 == 0 and w % 2 == 0
    cip = _round_up(ci, LANE)
    cop = _round_up(co, LANE)
    ho, wo = (h, w) if stride == 1 else (h // 2, w // 2)
    has_proj = (stride != 1) or (ci != co)

    x_nhwc = jnp.transpose(x_nchw, (0, 2, 3, 1)).astype(jnp.float32)
    # TODO(synk): the NCHW->NHWC transpose + channel pad remain wrapper-side XLA copies;
    #             a production variant would accept NHWC lane-padded activations directly.

    # bn1 batch stats (train mode, biased variance): stable two-pass XLA reduce, no extra launch.
    mean1 = jnp.mean(x_nhwc, axis=(0, 1, 2))
    var1 = jnp.mean(jnp.square(x_nhwc - mean1), axis=(0, 1, 2))
    s1 = params["g1"].astype(jnp.float32) * lax.rsqrt(var1 + EPS)
    scale1 = jnp.pad(s1, (0, cip - ci)).reshape(1, cip)
    shift1 = jnp.pad(params["b1"].astype(jnp.float32) - mean1 * s1, (0, cip - ci)).reshape(1, cip)

    # channels-last, lane-dense (channels zero-padded to a multiple of 128)
    x = jnp.pad(x_nhwc, ((0, 0), (0, 0), (0, 0), (0, cip - ci)))

    # 3x3 weights: OIHW -> HWIO, channel-padded, bf16 operands (f32 accumulation in-kernel)
    w1 = jnp.transpose(params["w1"], (2, 3, 1, 0))
    w1 = jnp.pad(w1, ((0, 0), (0, 0), (0, cip - ci), (0, cop - co))).astype(jnp.bfloat16)
    w2 = jnp.transpose(params["w2"], (2, 3, 1, 0))
    w2 = jnp.pad(w2, ((0, 0), (0, 0), (0, cop - co), (0, cop - co))).astype(jnp.bfloat16)
    if has_proj:
        wsc = params["wsc"][:, :, 0, 0].T                               # (Ci, Co)
        wsc = jnp.pad(wsc, ((0, cip - ci), (0, cop - co))).astype(jnp.bfloat16)

    w1_spec = pl.BlockSpec((3, 3, cip, cop), lambda b: (0, 0, 0, 0))
    w2_spec = pl.BlockSpec((3, 3, cop, cop), lambda b: (0, 0, 0, 0))
    st_spec = pl.BlockSpec((1, 2, cop), lambda b: (b, 0, 0))
    h2_spec = pl.BlockSpec((1, ho, wo, cop), lambda b: (b, 0, 0, 0))
    sc_spec = pl.BlockSpec((1, ho, wo, cop), lambda b: (b, 0, 0, 0))

    h2_shape = jax.ShapeDtypeStruct((n, ho, wo, cop), jnp.bfloat16)     # bf16 inter-pass buffer
    st_shape = jax.ShapeDtypeStruct((n, 2, cop), jnp.float32)
    sc_shape = jax.ShapeDtypeStruct((n, ho, wo, cop), jnp.float32)

    # ---- pass 1: bn1 + relu1 + conv1 (+ bn2 partial stats, + shortcut projection) -------
    if stride == 1:
        wp1 = _round_up(w + 2, 8)
        rows1 = (h + 2) * wp1 + 8
        x_spec = pl.BlockSpec((1, h, w, cip), lambda b: (b, 0, 0, 0))
        v_spec = pl.BlockSpec((1, cip), lambda b: (0, 0))
        pad_scr = pltpu.VMEM((rows1, cip), jnp.bfloat16)
        if has_proj:
            wsc_spec = pl.BlockSpec((cip, cop), lambda b: (0, 0))
            h2_, st2, sc = _pcall(
                _make_conv1_s1_kernel(True, wp1), (n,),
                [x_spec, v_spec, v_spec, w1_spec, wsc_spec],
                (h2_shape, st_shape, sc_shape), (h2_spec, st_spec, sc_spec),
                [pad_scr],
                x, scale1, shift1, w1, wsc)
        else:
            h2_, st2 = _pcall(
                _make_conv1_s1_kernel(False, wp1), (n,),
                [x_spec, v_spec, v_spec, w1_spec],
                (h2_shape, st_shape), (h2_spec, st_spec),
                [pad_scr],
                x, scale1, shift1, w1)
            sc = None
    else:
        w_half = w // 2
        wq = _round_up(w_half + 1, 8)
        rows_p = (h // 2 + 1) * wq + 8
        xw = x.reshape(n, h, w_half, 2 * cip)                           # free W-packing reshape
        scale1p = jnp.concatenate([scale1, scale1], axis=1)
        shift1p = jnp.concatenate([shift1, shift1], axis=1)
        x_spec = pl.BlockSpec((1, h, w_half, 2 * cip), lambda b: (b, 0, 0, 0))
        v_spec = pl.BlockSpec((1, 2 * cip), lambda b: (0, 0))
        wsc_spec = pl.BlockSpec((cip, cop), lambda b: (0, 0))
        h2_, st2, sc = _pcall(
            _make_conv1_s2_kernel(wq), (n,),
            [x_spec, v_spec, v_spec, w1_spec, wsc_spec],
            (h2_shape, st_shape, sc_shape), (h2_spec, st_spec, sc_spec),
            [pltpu.VMEM((rows_p, 2 * cip), jnp.bfloat16),
             pltpu.VMEM((rows_p, 2 * cip), jnp.bfloat16)],
            xw, scale1p, shift1p, w1, wsc)

    # ---- bn2 folding: tiny (2, Cop) cross-image reduction in plain JAX -------------------
    # TODO(synk): bn2 variance is E[x^2]-E[x]^2 in f32 from per-image partials (single-pass).
    tot2 = jnp.sum(st2, axis=0)
    cnt2 = float(n * ho * wo)
    mean2 = tot2[0] / cnt2
    var2 = jnp.maximum(tot2[1] / cnt2 - mean2 * mean2, 0.0)             # biased (PyTorch train)
    g2 = jnp.pad(params["g2"].astype(jnp.float32), (0, cop - co))
    b2 = jnp.pad(params["b2"].astype(jnp.float32), (0, cop - co))
    s2 = g2 * lax.rsqrt(var2 + EPS)
    scale2 = s2.reshape(1, cop)
    shift2 = (b2 - mean2 * s2).reshape(1, cop)

    # ---- pass 2: bn2 + relu2 + conv2 + shortcut add, fused -------------------------------
    wp2 = _round_up(wo + 2, 8)
    rows2 = (ho + 2) * wp2 + 8
    v2_spec = pl.BlockSpec((1, cop), lambda b: (0, 0))
    out_shape = jax.ShapeDtypeStruct((n, ho, wo, cop), jnp.float32)
    out_spec = pl.BlockSpec((1, ho, wo, cop), lambda b: (b, 0, 0, 0))
    if has_proj:
        add_arr, add_spec = sc, sc_spec
    else:
        add_arr = x                                                     # identity shortcut (f32)
        add_spec = pl.BlockSpec((1, h, w, cip), lambda b: (b, 0, 0, 0))
    out = _pcall(
        _make_conv2_add_kernel(wp2), (n,),
        [h2_spec, v2_spec, v2_spec, w2_spec, add_spec],
        out_shape, out_spec,
        [pltpu.VMEM((rows2, cop), jnp.bfloat16)],
        h2_, scale2, shift2, w2, add_arr)

    out = out[:, :, :, :co]                                             # strip channel padding
    return jnp.transpose(out, (0, 3, 1, 2))                             # back to NCHW


# -------------------------- pure-JAX reference ------------------------------ #

def residual_block_reference(x_nchw, params, stride):
    x = jnp.transpose(x_nchw, (0, 2, 3, 1)).astype(jnp.float32)

    def bn(hh, g, b):
        m = jnp.mean(hh, axis=(0, 1, 2), keepdims=True)
        v = jnp.mean((hh - m) ** 2, axis=(0, 1, 2), keepdims=True)
        return (hh - m) * lax.rsqrt(v + EPS) * g.reshape(1, 1, 1, -1) + b.reshape(1, 1, 1, -1)

    def conv(hh, w_oihw, s, pad):
        wgt = jnp.transpose(w_oihw, (2, 3, 1, 0))  # HWIO
        return lax.conv_general_dilated(
            hh, wgt, (s, s), ((pad, pad), (pad, pad)),
            dimension_numbers=("NHWC", "HWIO", "NHWC"),
            precision=lax.Precision.HIGHEST)

    hh = jax.nn.relu(bn(x, params["g1"], params["b1"]))
    hh = conv(hh, params["w1"], stride, 1)
    hh = jax.nn.relu(bn(hh, params["g2"], params["b2"]))
    hh = conv(hh, params["w2"], 1, 1)
    sc = conv(x, params["wsc"], stride, 0) if "wsc" in params else x
    return jnp.transpose(hh + sc, (0, 3, 1, 2))


if __name__ == "__main__":
    key = jax.random.PRNGKey(0)
    kx, kp1, kp2 = jax.random.split(key, 3)
    x = jax.random.normal(kx, (2, 4, 16, 16), jnp.float32)  # NCHW, like the PyTorch module

    # bf16 MXU operands / bf16 inter-pass buffer (f32 accumulation) vs f32 reference.
    TOL = dict(rtol=1e-2, atol=1e-2)

    # Case 1: stride=2, input_dim=4 -> output_dim=8 (1x1 conv projection shortcut).
    p1 = init_params(kp1, 4, 8, 2)
    out1 = jax.block_until_ready(residual_block_pallas(x, p1, 2))
    ref1 = residual_block_reference(x, p1, 2)
    np.testing.assert_allclose(np.asarray(out1), np.asarray(ref1), **TOL)

    # Case 2: stride=1, input_dim=output_dim=4 (identity shortcut path).
    p2 = init_params(kp2, 4, 4, 1)
    out2 = jax.block_until_ready(residual_block_pallas(x, p2, 1))
    ref2 = residual_block_reference(x, p2, 1)
    np.testing.assert_allclose(np.asarray(out2), np.asarray(ref2), **TOL)

    print("KERNEL_OK")
</pallas_src>

<mosaic_0001>
module attributes {stable_mosaic.version = 11 : i64} {
  func.func @kernel(%arg0: i32, %arg1: memref<1x16x8x256xf32, #tpu.memory_space<vmem>>, %arg2: memref<1x256xf32, #tpu.memory_space<vmem>>, %arg3: memref<1x256xf32, #tpu.memory_space<vmem>>, %arg4: memref<3x3x128x128xbf16, #tpu.memory_space<vmem>>, %arg5: memref<128x128xbf16, #tpu.memory_space<vmem>>, %arg6: memref<1x8x8x128xbf16, #tpu.memory_space<vmem>>, %arg7: memref<1x2x128xf32, #tpu.memory_space<vmem>>, %arg8: memref<1x8x8x128xf32, #tpu.memory_space<vmem>>, %arg9: memref<152x256xbf16, #tpu.memory_space<vmem>>, %arg10: memref<152x256xbf16, #tpu.memory_space<vmem>>) attributes {dimension_semantics = [#tpu.dimension_semantics<parallel>], iteration_bounds = array<i64: 2>, scalar_prefetch = 0 : i64, scratch_operands = 2 : i64, tpu.core_type = #tpu.core_type<tc>, window_params = [{transform_indices = @transform_0, window_bounds = array<i64: 1, 16, 8, 256>}, {pipeline_mode = #tpu.pipeline_mode<synchronous>, transform_indices = @transform_1, window_bounds = array<i64: 1, 256>}, {pipeline_mode = #tpu.pipeline_mode<synchronous>, transform_indices = @transform_2, window_bounds = array<i64: 1, 256>}, {pipeline_mode = #tpu.pipeline_mode<synchronous>, transform_indices = @transform_3, window_bounds = array<i64: 3, 3, 128, 128>}, {pipeline_mode = #tpu.pipeline_mode<synchronous>, transform_indices = @transform_4, window_bounds = array<i64: 128, 128>}, {transform_indices = @transform_5, window_bounds = array<i64: 1, 8, 8, 128>}, {transform_indices = @transform_6, window_bounds = array<i64: 1, 2, 128>}, {transform_indices = @transform_7, window_bounds = array<i64: 1, 8, 8, 128>}]} {
    %c0 = arith.constant 0 : index
    %c0_0 = arith.constant 0 : index
    %c0_1 = arith.constant 0 : index
    %c0_2 = arith.constant 0 : index
    %0 = vector.load %arg1[%c0, %c0_0, %c0_1, %c0_2] : memref<1x16x8x256xf32, #tpu.memory_space<vmem>>, vector<1x16x8x256xf32>
    %1 = vector.shape_cast %0 : vector<1x16x8x256xf32> to vector<16x8x256xf32>
    %c0_3 = arith.constant 0 : index
    %c0_4 = arith.constant 0 : index
    %2 = vector.load %arg2[%c0_3, %c0_4] : memref<1x256xf32, #tpu.memory_space<vmem>>, vector<1x256xf32>
    %3 = vector.shape_cast %2 : vector<1x256xf32> to vector<1x1x256xf32>
    %4 = vector.broadcast %3 : vector<1x1x256xf32> to vector<16x8x256xf32>
    %5 = arith.mulf %1, %4 : vector<16x8x256xf32>
    %c0_5 = arith.constant 0 : index
    %c0_6 = arith.constant 0 : index
    %6 = vector.load %arg3[%c0_5, %c0_6] : memref<1x256xf32, #tpu.memory_space<vmem>>, vector<1x256xf32>
    %7 = vector.shape_cast %6 : vector<1x256xf32> to vector<1x1x256xf32>
    %8 = vector.broadcast %7 : vector<1x1x256xf32> to vector<16x8x256xf32>
    %9 = arith.addf %5, %8 : vector<16x8x256xf32>
    %cst = arith.constant 0.000000e+00 : f32
    %10 = vector.broadcast %cst : f32 to vector<16x8x256xf32>
    %11 = arith.maximumf %9, %10 : vector<16x8x256xf32>
    %12 = vector.shape_cast %11 : vector<16x8x256xf32> to vector<8x2x8x256xf32>
    %cst_7 = arith.constant 0.000000e+00 : bf16
    %13 = vector.broadcast %cst_7 : bf16 to vector<8x1x256xbf16>
    %cst_8 = arith.constant 0.000000e+00 : bf16
    %14 = vector.broadcast %cst_8 : bf16 to vector<8x7x256xbf16>
    %15 = vector.extract_strided_slice %12 {offsets = [0, 0, 0, 0], sizes = [8, 1, 8, 256], strides = [1, 1, 1, 1]} : vector<8x2x8x256xf32> to vector<8x1x8x256xf32>
    %16 = vector.shape_cast %15 : vector<8x1x8x256xf32> to vector<8x8x256xf32>
    %17 = arith.truncf %16 : vector<8x8x256xf32> to vector<8x8x256xbf16>
    %18 = tpu.concatenate %13, %17, %14 in 1 : vector<8x1x256xbf16>, vector<8x8x256xbf16>, vector<8x7x256xbf16> -> vector<8x16x256xbf16>
    %19 = vector.extract_strided_slice %12 {offsets = [0, 1, 0, 0], sizes = [8, 1, 8, 256], strides = [1, 1, 1, 1]} : vector<8x2x8x256xf32> to vector<8x1x8x256xf32>
    %20 = vector.shape_cast %19 : vector<8x1x8x256xf32> to vector<8x8x256xf32>
    %21 = arith.truncf %20 : vector<8x8x256xf32> to vector<8x8x256xbf16>
    %22 = tpu.concatenate %13, %21, %14 in 1 : vector<8x1x256xbf16>, vector<8x8x256xbf16>, vector<8x7x256xbf16> -> vector<8x16x256xbf16>
    %23 = vector.shape_cast %18 : vector<8x16x256xbf16> to vector<128x256xbf16>
    %c0_9 = arith.constant 0 : index
    %c0_10 = arith.constant 0 : index
    %24 = vector.load %arg9[%c0_9, %c0_10] : memref<152x256xbf16, #tpu.memory_space<vmem>>, vector<128x256xbf16>
    tpu.vector_store %arg9[%c0_9, %c0_10], %23 {strides = array<i32>} : memref<152x256xbf16, #tpu.memory_space<vmem>>, vector<128x256xbf16>,
    %cst_11 = arith.constant 0.000000e+00 : bf16
    %25 = vector.broadcast %cst_11 : bf16 to vector<24x256xbf16>
    %c128 = arith.constant 128 : index
    %c0_12 = arith.constant 0 : index
    %26 = vector.load %arg9[%c128, %c0_12] : memref<152x256xbf16, #tpu.memory_space<vmem>>, vector<24x256xbf16>
    tpu.vector_store %arg9[%c128, %c0_12], %25 {strides = array<i32>} : memref<152x256xbf16, #tpu.memory_space<vmem>>, vector<24x256xbf16>,
    %cst_13 = arith.constant 0.000000e+00 : bf16
    %27 = vector.broadcast %cst_13 : bf16 to vector<16x256xbf16>
    %c0_14 = arith.constant 0 : index
    %c0_15 = arith.constant 0 : index
    %28 = vector.load %arg10[%c0_14, %c0_15] : memref<152x256xbf16, #tpu.memory_space<vmem>>, vector<16x256xbf16>
    tpu.vector_store %arg10[%c0_14, %c0_15], %27 {strides = array<i32>} : memref<152x256xbf16, #tpu.memory_space<vmem>>, vector<16x256xbf16>,
    %29 = vector.shape_cast %22 : vector<8x16x256xbf16> to vector<128x256xbf16>
    %c16 = arith.constant 16 : index
    %c0_16 = arith.constant 0 : index
    %30 = vector.load %arg10[%c16, %c0_16] : memref<152x256xbf16, #tpu.memory_space<vmem>>, vector<128x256xbf16>
    tpu.vector_store %arg10[%c16, %c0_16], %29 {strides = array<i32>} : memref<152x256xbf16, #tpu.memory_space<vmem>>, vector<128x256xbf16>,
    %cst_17 = arith.constant 0.000000e+00 : bf16
    %31 = vector.broadcast %cst_17 : bf16 to vector<8x256xbf16>
    %c144 = arith.constant 144 : index
    %c0_18 = arith.constant 0 : index
    %32 = vector.load %arg10[%c144, %c0_18] : memref<152x256xbf16, #tpu.memory_space<vmem>>, vector<8x256xbf16>
    tpu.vector_store %arg10[%c144, %c0_18], %31 {strides = array<i32>} : memref<152x256xbf16, #tpu.memory_space<vmem>>, vector<8x256xbf16>,
    %c0_19 = arith.constant 0 : index
    %c128_20 = arith.constant 128 : index
    %33 = vector.load %arg10[%c0_19, %c128_20] : memref<152x256xbf16, #tpu.memory_space<vmem>>, vector<128x128xbf16>
    %c0_21 = arith.constant 0 : index
    %c0_22 = arith.constant 0 : index
    %c0_23 = arith.constant 0 : index
    %c0_24 = arith.constant 0 : index
    %34 = vector.load %arg4[%c0_21, %c0_22, %c0_23, %c0_24] : memref<3x3x128x128xbf16, #tpu.memory_space<vmem>>, vector<1x1x128x128xbf16>
    %35 = vector.shape_cast %34 : vector<1x1x128x128xbf16> to vector<128x128xbf16>
    %cst_25 = arith.constant dense<0.000000e+00> : vector<128x128xf32>
    %36 = tpu.matmul %33, %35, %cst_25 {dimension_numbers = #tpu.dot_dimension_numbers<[1], [0], [0], [1], [0, 0, 1, 1], [], []>} : vector<128x128xbf16>, vector<128x128xbf16>, vector<128x128xf32> -> vector<128x128xf32>
    %c1 = arith.constant 1 : index
    %c0_26 = arith.constant 0 : index
    %37 = vector.load %arg10[%c1, %c0_26] : memref<152x256xbf16, #tpu.memory_space<vmem>>, vector<128x128xbf16>
    %c0_27 = arith.constant 0 : index
    %c1_28 = arith.constant 1 : index
    %c0_29 = arith.constant 0 : index
    %c0_30 = arith.constant 0 : index
    %38 = vector.load %arg4[%c0_27, %c1_28, %c0_29, %c0_30] : memref<3x3x128x128xbf16, #tpu.memory_space<vmem>>, vector<1x1x128x128xbf16>
    %39 = vector.shape_cast %38 : vector<1x1x128x128xbf16> to vector<128x128xbf16>
    %cst_31 = arith.constant dense<0.000000e+00> : vector<128x128xf32>
    %40 = tpu.matmul %37, %39, %cst_31 {dimension_numbers = #tpu.dot_dimension_numbers<[1], [0], [0], [1], [0, 0, 1, 1], [], []>} : vector<128x128xbf16>, vector<128x128xbf16>, vector<128x128xf32> -> vector<128x128xf32>
    %41 = arith.addf %36, %40 : vector<128x128xf32>
    %c1_32 = arith.constant 1 : index
    %c128_33 = arith.constant 128 : index
    %42 = vector.load %arg10[%c1_32, %c128_33] : memref<152x256xbf16, #tpu.memory_space<vmem>>, vector<128x128xbf16>
    %c0_34 = arith.constant 0 : index
    %c2 = arith.constant 2 : index
    %c0_35 = arith.constant 0 : index
    %c0_36 = arith.constant 0 : index
    %43 = vector.load %arg4[%c0_34, %c2, %c0_35, %c0_36] : memref<3x3x128x128xbf16, #tpu.memory_space<vmem>>, vector<1x1x128x128xbf16>
    %44 = vector.shape_cast %43 : vector<1x1x128x128xbf16> to vector<128x128xbf16>
    %cst_37 = arith.constant dense<0.000000e+00> : vector<128x128xf32>
    %45 = tpu.matmul %42, %44, %cst_37 {dimension_numbers = #tpu.dot_dimension_numbers<[1], [0], [0], [1], [0, 0, 1, 1], [], []>} : vector<128x128xbf16>, vector<128x128xbf16>, vector<128x128xf32> -> vector<128x128xf32>
    %46 = arith.addf %41, %45 : vector<128x128xf32>
    %c0_38 = arith.constant 0 : index
    %c128_39 = arith.constant 128 : index
    %47 = vector.load %arg9[%c0_38, %c128_39] : memref<152x256xbf16, #tpu.memory_space<vmem>>, vector<128x128xbf16>
    %c1_40 = arith.constant 1 : index
    %c0_41 = arith.constant 0 : index
    %c0_42 = arith.constant 0 : index
    %c0_43 = arith.constant 0 : index
    %48 = vector.load %arg4[%c1_40, %c0_41, %c0_42, %c0_43] : memref<3x3x128x128xbf16, #tpu.memory_space<vmem>>, vector<1x1x128x128xbf16>
    %49 = vector.shape_cast %48 : vector<1x1x128x128xbf16> to vector<128x128xbf16>
    %cst_44 = arith.constant dense<0.000000e+00> : vector<128x128xf32>
    %50 = tpu.matmul %47, %49, %cst_44 {dimension_numbers = #tpu.dot_dimension_numbers<[1], [0], [0], [1], [0, 0, 1, 1], [], []>} : vector<128x128xbf16>, vector<128x128xbf16>, vector<128x128xf32> -> vector<128x128xf32>
    %51 = arith.addf %46, %50 : vector<128x128xf32>
    %c1_45 = arith.constant 1 : index
    %c0_46 = arith.constant 0 : index
    %52 = vector.load %arg9[%c1_45, %c0_46] : memref<152x256xbf16, #tpu.memory_space<vmem>>, vector<128x128xbf16>
    %c1_47 = arith.constant 1 : index
    %c1_48 = arith.constant 1 : index
    %c0_49 = arith.constant 0 : index
    %c0_50 = arith.constant 0 : index
    %53 = vector.load %arg4[%c1_47, %c1_48, %c0_49, %c0_50] : memref<3x3x128x128xbf16, #tpu.memory_space<vmem>>, vector<1x1x128x128xbf16>
    %54 = vector.shape_cast %53 : vector<1x1x128x128xbf16> to vector<128x128xbf16>
    %cst_51 = arith.constant dense<0.000000e+00> : vector<128x128xf32>
    %55 = tpu.matmul %52, %54, %cst_51 {dimension_numbers = #tpu.dot_dimension_numbers<[1], [0], [0], [1], [0, 0, 1, 1], [], []>} : vector<128x128xbf16>, vector<128x128xbf16>, vector<128x128xf32> -> vector<128x128xf32>
    %56 = arith.addf %51, %55 : vector<128x128xf32>
    %c1_52 = arith.constant 1 : index
    %c128_53 = arith.constant 128 : index
    %57 = vector.load %arg9[%c1_52, %c128_53] : memref<152x256xbf16, #tpu.memory_space<vmem>>, vector<128x128xbf16>
    %c1_54 = arith.constant 1 : index
    %c2_55 = arith.constant 2 : index
    %c0_56 = arith.constant 0 : index
    %c0_57 = arith.constant 0 : index
    %58 = vector.load %arg4[%c1_54, %c2_55, %c0_56, %c0_57] : memref<3x3x128x128xbf16, #tpu.memory_space<vmem>>, vector<1x1x128x128xbf16>
    %59 = vector.shape_cast %58 : vector<1x1x128x128xbf16> to vector<128x128xbf16>
    %cst_58 = arith.constant dense<0.000000e+00> : vector<128x128xf32>
    %60 = tpu.matmul %57, %59, %cst_58 {dimension_numbers = #tpu.dot_dimension_numbers<[1], [0], [0], [1], [0, 0, 1, 1], [], []>} : vector<128x128xbf16>, vector<128x128xbf16>, vector<128x128xf32> -> vector<128x128xf32>
    %61 = arith.addf %56, %60 : vector<128x128xf32>
    %c16_59 = arith.constant 16 : index
    %c128_60 = arith.constant 128 : index
    %62 = vector.load %arg10[%c16_59, %c128_60] : memref<152x256xbf16, #tpu.memory_space<vmem>>, vector<128x128xbf16>
    %c2_61 = arith.constant 2 : index
    %c0_62 = arith.constant 0 : index
    %c0_63 = arith.constant 0 : index
    %c0_64 = arith.constant 0 : index
    %63 = vector.load %arg4[%c2_61, %c0_62, %c0_63, %c0_64] : memref<3x3x128x128xbf16, #tpu.memory_space<vmem>>, vector<1x1x128x128xbf16>
    %64 = vector.shape_cast %63 : vector<1x1x128x128xbf16> to vector<128x128xbf16>
    %cst_65 = arith.constant dense<0.000000e+00> : vector<128x128xf32>
    %65 = tpu.matmul %62, %64, %cst_65 {dimension_numbers = #tpu.dot_dimension_numbers<[1], [0], [0], [1], [0, 0, 1, 1], [], []>} : vector<128x128xbf16>, vector<128x128xbf16>, vector<128x128xf32> -> vector<128x128xf32>
    %66 = arith.addf %61, %65 : vector<128x128xf32>
    %c17 = arith.constant 17 : index
    %c0_66 = arith.constant 0 : index
    %67 = vector.load %arg10[%c17, %c0_66] : memref<152x256xbf16, #tpu.memory_space<vmem>>, vector<128x128xbf16>
    %c2_67 = arith.constant 2 : index
    %c1_68 = arith.constant 1 : index
    %c0_69 = arith.constant 0 : index
    %c0_70 = arith.constant 0 : index
    %68 = vector.load %arg4[%c2_67, %c1_68, %c0_69, %c0_70] : memref<3x3x128x128xbf16, #tpu.memory_space<vmem>>, vector<1x1x128x128xbf16>
    %69 = vector.shape_cast %68 : vector<1x1x128x128xbf16> to vector<128x128xbf16>
    %cst_71 = arith.constant dense<0.000000e+00> : vector<128x128xf32>
    %70 = tpu.matmul %67, %69, %cst_71 {dimension_numbers = #tpu.dot_dimension_numbers<[1], [0], [0], [1], [0, 0, 1, 1], [], []>} : vector<128x128xbf16>, vector<128x128xbf16>, vector<128x128xf32> -> vector<128x128xf32>
    %71 = arith.addf %66, %70 : vector<128x128xf32>
    %c17_72 = arith.constant 17 : index
    %c128_73 = arith.constant 128 : index
    %72 = vector.load %arg10[%c17_72, %c128_73] : memref<152x256xbf16, #tpu.memory_space<vmem>>, vector<128x128xbf16>
    %c2_74 = arith.constant 2 : index
    %c2_75 = arith.constant 2 : index
    %c0_76 = arith.constant 0 : index
    %c0_77 = arith.constant 0 : index
    %73 = vector.load %arg4[%c2_74, %c2_75, %c0_76, %c0_77] : memref<3x3x128x128xbf16, #tpu.memory_space<vmem>>, vector<1x1x128x128xbf16>
    %74 = vector.shape_cast %73 : vector<1x1x128x128xbf16> to vector<128x128xbf16>
    %cst_78 = arith.constant dense<0.000000e+00> : vector<128x128xf32>
    %75 = tpu.matmul %72, %74, %cst_78 {dimension_numbers = #tpu.dot_dimension_numbers<[1], [0], [0], [1], [0, 0, 1, 1], [], []>} : vector<128x128xbf16>, vector<128x128xbf16>, vector<128x128xf32> -> vector<128x128xf32>
    %76 = arith.addf %71, %75 : vector<128x128xf32>
    %77 = vector.shape_cast %76 : vector<128x128xf32> to vector<8x16x128xf32>
    %78 = vector.extract_strided_slice %77 {offsets = [0, 0, 0], sizes = [8, 8, 128], strides = [1, 1, 1]} : vector<8x16x128xf32> to vector<8x8x128xf32>
    %79 = arith.truncf %78 : vector<8x8x128xf32> to vector<8x8x128xbf16>
    %c0_79 = arith.constant 0 : index
    %c0_80 = arith.constant 0 : index
    %c0_81 = arith.constant 0 : index
    %c0_82 = arith.constant 0 : index
    %80 = vector.load %arg6[%c0_79, %c0_80, %c0_81, %c0_82] : memref<1x8x8x128xbf16, #tpu.memory_space<vmem>>, vector<1x8x8x128xbf16>
    %81 = vector.shape_cast %80 : vector<1x8x8x128xbf16> to vector<8x8x128xbf16>
    %82 = vector.shape_cast %79 : vector<8x8x128xbf16> to vector<1x8x8x128xbf16>
    tpu.vector_store %arg6[%c0_79, %c0_80, %c0_81, %c0_82], %82 {strides = array<i32>} : memref<1x8x8x128xbf16, #tpu.memory_space<vmem>>, vector<1x8x8x128xbf16>,
    %83 = vector.shape_cast %78 : vector<8x8x128xf32> to vector<64x128xf32>
    %cst_83 = arith.constant dense<0.000000e+00> : vector<128xf32>
    %84 = vector.multi_reduction <add>, %83, %cst_83 [0] : vector<64x128xf32> to vector<128xf32>
    %85 = vector.shape_cast %84 : vector<128xf32> to vector<1x128xf32>
    %c0_84 = arith.constant 0 : index
    %c0_85 = arith.constant 0 : index
    %c0_86 = arith.constant 0 : index
    %86 = vector.load %arg7[%c0_84, %c0_85, %c0_86] : memref<1x2x128xf32, #tpu.memory_space<vmem>>, vector<1x1x128xf32>
    %87 = vector.shape_cast %86 : vector<1x1x128xf32> to vector<1x128xf32>
    %88 = vector.shape_cast %85 : vector<1x128xf32> to vector<1x1x128xf32>
    tpu.vector_store %arg7[%c0_84, %c0_85, %c0_86], %88 {strides = array<i32>} : memref<1x2x128xf32, #tpu.memory_space<vmem>>, vector<1x1x128xf32>,
    %89 = arith.mulf %83, %83 : vector<64x128xf32>
    %cst_87 = arith.constant dense<0.000000e+00> : vector<128xf32>
    %90 = vector.multi_reduction <add>, %89, %cst_87 [0] : vector<64x128xf32> to vector<128xf32>
    %91 = vector.shape_cast %90 : vector<128xf32> to vector<1x128xf32>
    %c0_88 = arith.constant 0 : index
    %c1_89 = arith.constant 1 : index
    %c0_90 = arith.constant 0 : index
    %92 = vector.load %arg7[%c0_88, %c1_89, %c0_90] : memref<1x2x128xf32, #tpu.memory_space<vmem>>, vector<1x1x128xf32>
    %93 = vector.shape_cast %92 : vector<1x1x128xf32> to vector<1x128xf32>
    %94 = vector.shape_cast %91 : vector<1x128xf32> to vector<1x1x128xf32>
    tpu.vector_store %arg7[%c0_88, %c1_89, %c0_90], %94 {strides = array<i32>} : memref<1x2x128xf32, #tpu.memory_space<vmem>>, vector<1x1x128xf32>,
    %95 = vector.shape_cast %1 : vector<16x8x256xf32> to vector<8x2x8x256xf32>
    %96 = vector.extract_strided_slice %95 {offsets = [0, 0, 0, 0], sizes = [8, 1, 8, 128], strides = [1, 1, 1, 1]} : vector<8x2x8x256xf32> to vector<8x1x8x128xf32>
    %97 = vector.shape_cast %96 : vector<8x1x8x128xf32> to vector<8x8x128xf32>
    %98 = vector.shape_cast %97 : vector<8x8x128xf32> to vector<64x128xf32>
    %99 = arith.truncf %98 : vector<64x128xf32> to vector<64x128xbf16>
    %c0_91 = arith.constant 0 : index
    %c0_92 = arith.constant 0 : index
    %100 = vector.load %arg5[%c0_91, %c0_92] : memref<128x128xbf16, #tpu.memory_space<vmem>>, vector<128x128xbf16>
    %cst_93 = arith.constant dense<0.000000e+00> : vector<64x128xf32>
    %101 = tpu.matmul %99, %100, %cst_93 {dimension_numbers = #tpu.dot_dimension_numbers<[1], [0], [0], [1], [0, 0, 1, 1], [], []>} : vector<64x128xbf16>, vector<128x128xbf16>, vector<64x128xf32> -> vector<64x128xf32>
    %102 = vector.shape_cast %101 : vector<64x128xf32> to vector<8x8x128xf32>
    %c0_94 = arith.constant 0 : index
    %c0_95 = arith.constant 0 : index
    %c0_96 = arith.constant 0 : index
    %c0_97 = arith.constant 0 : index
    %103 = vector.load %arg8[%c0_94, %c0_95, %c0_96, %c0_97] : memref<1x8x8x128xf32, #tpu.memory_space<vmem>>, vector<1x8x8x128xf32>
    %104 = vector.shape_cast %103 : vector<1x8x8x128xf32> to vector<8x8x128xf32>
    %105 = vector.shape_cast %102 : vector<8x8x128xf32> to vector<1x8x8x128xf32>
    tpu.vector_store %arg8[%c0_94, %c0_95, %c0_96, %c0_97], %105 {strides = array<i32>} : memref<1x8x8x128xf32, #tpu.memory_space<vmem>>, vector<1x8x8x128xf32>,
    return
  }
  func.func @transform_0(%arg0: i32) -> (i32, i32, i32, i32) {
    %c0_i32 = arith.constant 0 : i32
    %c0_i32_0 = arith.constant 0 : i32
    %c0_i32_1 = arith.constant 0 : i32
    %c0_i32_2 = arith.constant 0 : i32
    return %arg0, %c0_i32, %c0_i32_0, %c0_i32_1 : i32, i32, i32, i32
  }
  func.func @transform_1(%arg0: i32) -> (i32, i32) {
    %c0_i32 = arith.constant 0 : i32
    %c0_i32_0 = arith.constant 0 : i32
    %c0_i32_1 = arith.constant 0 : i32
    return %c0_i32, %c0_i32_0 : i32, i32
  }
  func.func @transform_2(%arg0: i32) -> (i32, i32) {
    %c0_i32 = arith.constant 0 : i32
    %c0_i32_0 = arith.constant 0 : i32
    %c0_i32_1 = arith.constant 0 : i32
    return %c0_i32, %c0_i32_0 : i32, i32
  }
  func.func @transform_3(%arg0: i32) -> (i32, i32, i32, i32) {
    %c0_i32 = arith.constant 0 : i32
    %c0_i32_0 = arith.constant 0 : i32
    %c0_i32_1 = arith.constant 0 : i32
    %c0_i32_2 = arith.constant 0 : i32
    %c0_i32_3 = arith.constant 0 : i32
    return %c0_i32, %c0_i32_0, %c0_i32_1, %c0_i32_2 : i32, i32, i32, i32
  }
  func.func @transform_4(%arg0: i32) -> (i32, i32) {
    %c0_i32 = arith.constant 0 : i32
    %c0_i32_0 = arith.constant 0 : i32
    %c0_i32_1 = arith.constant 0 : i32
    return %c0_i32, %c0_i32_0 : i32, i32
  }
  func.func @transform_5(%arg0: i32) -> (i32, i32, i32, i32) {
    %c0_i32 = arith.constant 0 : i32
    %c0_i32_0 = arith.constant 0 : i32
    %c0_i32_1 = arith.constant 0 : i32
    %c0_i32_2 = arith.constant 0 : i32
    return %arg0, %c0_i32, %c0_i32_0, %c0_i32_1 : i32, i32, i32, i32
  }
  func.func @transform_6(%arg0: i32) -> (i32, i32, i32) {
    %c0_i32 = arith.constant 0 : i32
    %c0_i32_0 = arith.constant 0 : i32
    %c0_i32_1 = arith.constant 0 : i32
    return %arg0, %c0_i32, %c0_i32_0 : i32, i32, i32
  }
  func.func @transform_7(%arg0: i32) -> (i32, i32, i32, i32) {
    %c0_i32 = arith.constant 0 : i32
    %c0_i32_0 = arith.constant 0 : i32
    %c0_i32_1 = arith.constant 0 : i32
    %c0_i32_2 = arith.constant 0 : i32
    return %arg0, %c0_i32, %c0_i32_0, %c0_i32_1 : i32, i32, i32, i32
  }
}

</mosaic_0001>

<bundles_post_ra>
// kernel: tpu_custom_call.1
= control target key start
LH: loop header
LB: loop body
LE: loop exit
PB: predicated region body
PF: predicated region fallthrough
CT: control target
= control target key end

     0   :  { %13 = vsyncpa [#allocation5], 0  ;;  %s5983_s0 = inlined_call_operand.hbm [shape: f32[2,16,8,256], index: 0, kind: input, shape index: {}]   ;;  %s5984_s1 = inlined_call_operand.vmem [shape: f32[1,256], index: 1, kind: input, shape index: {}]   ;;  %s5985_s2 = inlined_call_operand.vmem [shape: f32[1,256], index: 2, kind: input, shape index: {}]   ;;  %s5986_s3 = inlined_call_operand.hbm [shape: bf16[3,3,128,128], index: 3, kind: input, shape index: {}]   ;;  %s5987_s4 = inlined_call_operand.hbm [shape: bf16[128,128], index: 4, kind: input, shape index: {}]   ;;  %s5988_s5 = inlined_call_operand.hbm [shape: bf16[2,8,8,128], index: 5, kind: output, shape index: {0}]   ;;  %s5989_s6 = inlined_call_operand.hbm [shape: f32[2,2,128], index: 6, kind: output, shape index: {1}]   ;;  %s5990_s7 = inlined_call_operand.hbm [shape: f32[2,8,8,128], index: 7, kind: output, shape index: {2}]  }
   0x1   :  { %15 = vsyncpa [#allocation5 + $0x1], 0 }
   0x2   :  { %16 = vsyncpa [#allocation8], 0 }
   0x3   :  { %17 = vsyncpa [#allocation6], 0 }
   0x4   :  { %19 = vsyncpa [#allocation6 + $0x1], 0 }
   0x5   :  { %20 = vsyncpa [#allocation12], 0 }
   0x6   :  { %22 = vsyncpa [#allocation12 + $0x1], 0  ;;  %s5256_s24 = smov 0   ;;  %s5258_s25 = smov 0  }
   0x7   :  { %s5260_s26 = smov 0   ;;  %s5262_s27 = smov 0  }
   0x8 LB: > { %s5277_s28 = sadd.s32 4294967295, %s5199_s27   ;;  %s5994_s29 = sadd.s32 4294967294, %s5199_s27   ;;  %s5199_s27 = sphi %s5262_s27, %s6016_s27   ;;  %s5195_s26 = sphi %s5260_s26, %s6015_s26   ;;  %s5191_s25 = sphi %s5258_s25, %s6014_s25   ;;  %s5187_s24 = sphi %s5256_s24, %s6013_s24  }
   0x9   : > { %p48_p0 = scmp.ne.s32.totalorder %s5191_s25, %s5187_s24  ;;  %p5991_p1 = scmp.eq.s32.totalorder %s5277_s28, 0 }
   0xa   : > { %p162_p3 = scmp.eq.s32.totalorder %s5994_s29, 1  ;;  %p3903_p5 = scmp.ge.s32.totalorder %s5199_s27, 1 }
   0xb   : > { %p5288_p4 = por %p5991_p1, %p48_p0  ;;  %p221_p7 = scmp.lt.s32.totalorder %s5199_s27, 3 }
   0xc   : > { %p5293_p6 = por %p162_p3, %p48_p0  ;;  %s5201_s10 = smov [#allocation7]  }
   0xd   : > { %s5995_s30 = scalar_select %p5288_p4, 1, 0 }
   0xe   : > { %s5996_s8 = scalar_select %p5293_p6, 1, 0 }
   0xf   : > { %p5298_p8 = pnand %p3903_p5, %p221_p7  ;;  %s239_s11 = sshll.u32 %s5201_s10, 4  ;;  %s5302_s11 = int_to_ptr.vmem [resolvable:$true] %s239_s11 }
  0x10   : > { %s5202_s13 = smov [#allocation9]   ;;  %s4983_s17 = scalar_lea.hbm %s5986_s3, 9216 }
  0x11   : > { %p4747_p9 = pneg %p5298_p8  ;;  %s252_s14 = sshll.u32 %s5202_s13, 4  ;;  %s5313_s14 = int_to_ptr.vmem [resolvable:$true] %s252_s14 }
  0x12   : > { %p4984_p12 = scmp.ne.s32.totalorder %s5986_s3, %s4983_s17  ;;  %p4990_p5 = scmp.lt.u32.totalorder %s4983_s17, %s5986_s3 }
  0x13   : > { %p5309_p11 = pnand %p4747_p9, %p5991_p1 }
  0x15   : > { %p4985_p13 = pneg %p5309_p11 }
  0x17   : > { %p4986_p0 = pnand %p4985_p13, %p4984_p12 }
  0x19   : > { %p4987_p3 = pneg %p4986_p0 }
  0x1b   : > { %p4992_p7 = pnand %p4990_p5, %p4987_p3 }
  0x1d   : > { %4995 = shalt.err (!%p4992_p7)
}
  0x1e   : > { %s4996_s22 = scalar_lea.vmem %s5302_s11, 9216  ;;  %p5004_p2 = scmp.lt.s32.totalorder %s5302_s11, %s5302_s11 }
  0x1f   : > { %p4997_p9 = scmp.ne.s32.totalorder %s5302_s11, %s4996_s22  ;;  %p5005_p12 = scmp.lt.s32.totalorder %s4996_s22, %s4996_s22 }
  0x21   : > { %p4999_p10 = pnand %p4997_p9, %p4985_p13  ;;  %p5006_p0 = por %p5005_p12, %p5004_p2 }
  0x23   : > { %p5000_p1 = pneg %p4999_p10 }
  0x25   : > { %p5007_p6 = pnand %p5006_p0, %p5000_p1 }
  0x27   : > { %5010 = shalt.err (!%p5007_p6)
}
  0x28   : > { %s5203_s23 = smov 64   ;;  %s5204_s10 = smov 4  }
  0x29   : > { %4750 = dma.hbm_to_vmem [thread:$0]  (!%p5309_p11), %s5986_s3, 9216, %s5302_s11, [#allocation8], %s5203_s23, %s5203_s23, %s5204_s10  }
  0x2a   : > { %s5011_s18 = scalar_lea.hbm %s5987_s4, 1024 }
  0x2b   : > { %p5012_p2 = scmp.ne.s32.totalorder %s5987_s4, %s5011_s18  ;;  %p5018_p10 = scmp.lt.u32.totalorder %s5011_s18, %s5987_s4 }
  0x2d   : > { %p5014_p1 = pnand %p5012_p2, %p4985_p13 }
  0x2f   : > { %p5015_p6 = pneg %p5014_p1 }
  0x31   : > { %p5020_p3 = pnand %p5018_p10, %p5015_p6 }
  0x33   : > { %5023 = shalt.err (!%p5020_p3)
}
  0x34   : > { %s5024_s11 = scalar_lea.vmem %s5313_s14, 1024  ;;  %p5032_p12 = scmp.lt.s32.totalorder %s5313_s14, %s5313_s14 }
  0x35   : > { %p5025_p5 = scmp.ne.s32.totalorder %s5313_s14, %s5024_s11  ;;  %p5033_p0 = scmp.lt.s32.totalorder %s5024_s11, %s5024_s11 }
  0x37   : > { %p5027_p7 = pnand %p5025_p5, %p4985_p13  ;;  %p5034_p2 = por %p5033_p0, %p5032_p12 }
  0x39   : > { %p5028_p9 = pneg %p5027_p7 }
  0x3b   : > { %p5035_p1 = pnand %p5034_p2, %p5028_p9 }
  0x3d   : > { %5038 = shalt.err (!%p5035_p1)
}
  0x3e   : > { %4753 = dma.hbm_to_vmem [thread:$0]  (!%p5309_p11), %s5987_s4, 1024, %s5313_s14, [#allocation8], %s5203_s23, %s5203_s23, %s5204_s10  }
  0x3f   : > { %s5368_s16 = sadd.s32 1, %s5199_s27   ;;  %s35_s12 = sadd.s32 1, %s5195_s26 }
  0x40   : > { %s32_s17 = ssub.s32 %s5199_s27, %s5368_s16  ;;  %p42_p13 = scmp.ne.s32.totalorder %s5195_s26, %s5191_s25 }
  0x41   : > { %p33_p6 = scmp.eq.s32.totalorder %s32_s17, 0  ;;  %p43_p10 = scmp.eq.s32.totalorder %s5199_s27, 0 }
  0x42   : > { %p5999_p3 = scmp.eq.s32.totalorder %s5277_s28, 1  ;;  %p4770_p7 = scmp.lt.s32.totalorder %s5199_s27, 2 }
  0x43   : > { %s5384_s19 = scalar_select %p33_p6, %s5195_s26, %s35_s12  }
  0x44   : > { %p5378_p5 = por %p5999_p3, %p42_p13  ;;  %p44_p9 = por %p43_p10, %p42_p13 }
  0x45   : > { %s266_s20 = sand.u32 1, %s5195_s26   ;;  %s4117_s14 = sshll.u32 %s5199_s27, 12 }
  0x46   : > { %s6000_s18 = scalar_select %p5378_p5, 1, 0 }
  0x47   : > { %s3907_s21 = sshll.u32 %s266_s20, 8  ;;  %s5391_s22 = scalar_lea.hbm %s5983_s0, %s4117_s14 }
  0x48   : > { %s270_s11 = scalar_lea.vmem [#allocation4], %s3907_s21  ;;  %p5395_p11 = pnand %p4770_p7, %p44_p9 }
  0x49   : > { %s277_s13 = sshll.u32 %s270_s11, 4  ;;  %s5399_s12 = scalar_lea.sflag [#allocation5], %s266_s20  ;;  %s5393_s13 = int_to_ptr.vmem [resolvable:$true] %s277_s13 }
  0x4a   : > { %s5039_s17 = scalar_lea.hbm %s5391_s22, 4096  ;;  %p5041_p0 = pneg %p5395_p11 }
  0x4b   : > { %p5040_p12 = scmp.ne.s32.totalorder %s5391_s22, %s5039_s17  ;;  %s5044_s23 = scalar_lea.hbm %s5983_s0, 8192 }
  0x4c   : > { %p5045_p13 = scmp.lt.u32.totalorder %s5391_s22, %s5983_s0  ;;  %p5046_p6 = scmp.lt.u32.totalorder %s5044_s23, %s5039_s17 }
  0x4d   : > { %p5042_p2 = pnand %p5041_p0, %p5040_p12  ;;  %p5048_p3 = scmp.lt.u32.totalorder %s5039_s17, %s5391_s22 }
  0x4e   : > { %p5047_p10 = por %p5046_p6, %p5045_p13 }
  0x4f   : > { %p5043_p1 = pneg %p5042_p2 }
  0x50   : > { %p5049_p7 = por %p5048_p3, %p5047_p10 }
  0x52   : > { %p5050_p9 = pnand %p5049_p7, %p5043_p1 }
  0x54   : > { %5053 = shalt.err (!%p5050_p9)
}
  0x55   : > { %s5054_s20 = scalar_lea.vmem %s5393_s13, 4096  ;;  %s5205_s21 = smov [#allocation4]  }
  0x56   : > { %p5055_p12 = scmp.ne.s32.totalorder %s5393_s13, %s5054_s20  ;;  %s5059_s14 = sshll.u32 %s5205_s21, 4  ;;  %s5060_s14 = int_to_ptr.vmem [resolvable:$false] %s5059_s14 }
  0x57   : > { %s5061_s10 = scalar_lea.vmem %s5060_s14, 8192  ;;  %p5062_p4 = scmp.lt.s32.totalorder %s5393_s13, %s5060_s14 }
  0x58   : > { %p5057_p2 = pnand %p5055_p12, %p5041_p0  ;;  %p5063_p13 = scmp.lt.s32.totalorder %s5061_s10, %s5054_s20 }
  0x5a   : > { %p5058_p5 = pneg %p5057_p2  ;;  %p5064_p6 = por %p5063_p13, %p5062_p4 }
  0x5c   : > { %p5065_p10 = pnand %p5064_p6, %p5058_p5 }
  0x5e   : > { %5068 = shalt.err (!%p5065_p10)
}
  0x5f   : > { %s5206_s17 = smov 256   ;;  %s5207_s23 = smov 16  }
  0x60   : > { %4757 = dma.hbm_to_vmem [thread:$0]  (!%p5395_p11), %s5391_s22, 4096, %s5393_s13, %s5399_s12, %s5206_s17, %s5206_s17, %s5207_s23  }
  0x61   : > { %289 = sbr.rel (%p5298_p8) target bundleno = 652 (0x28c), region = 40  ;;  %s5430_s11 = sand.u32 (!%p5298_p8), 1, %s5191_s25  }
  0x62   : > { %s3911_s20 = sshll.u32 (!%p5298_p8), %s5430_s11, 8  ;;  %s292_s21 = scalar_lea.sflag (!%p5298_p8), [#allocation5], %s5430_s11 }
  0x63   : > { %s5434_s14 = scalar_lea.vmem (!%p5298_p8), [#allocation4], %s3911_s20  ;;  %p6002_p4 = scmp.ne.s32.totalorder (!%p5298_p8), %s5995_s30, 0 }
  0x68   : > { %5170 = dma.done.wait (%p6002_p4), %s292_s21, 4096  }
  0x69   : > { %5172 = vsyncadd (%p6002_p4), %s292_s21, 4294963200  ;;  %p6003_p5 = scmp.eq.s32.totalorder %s5277_s28, 0 }
  0x6b   : > { %5174 = dma.done.wait (%p6003_p5), [#allocation8], 10240   ;;  %p6004_p8 = pmov %p6003_p5 }
  0x6c   : > { %v5208_v0 = vmov 0   ;;  %v4817_v1 = vld [vmem:[#allocation7 + $0x40] sm:$0xff]   ;;  %v4819_v3 = vld [vmem:[#allocation7 + $0x48] sm:$0xff]   ;;  %v4821_v5 = vld [vmem:[#allocation7 + $0x50] sm:$0xff]   ;;  %v379_v6 = vlaneseq  ;;  %vm642_vm0 = vsmask.f32 256 }
  0x6d   : > { %5176 = vsyncadd (%p6004_p8), [#allocation8], 4294957056  ;;  %954 = vst [vmem:[#allocation3] sm:$0xff] %v5208_v0  ;;  %v4818_v2 = vld [vmem:[#allocation7 + $0x100] sm:$0xff]   ;;  %4299 = vmatprep.subr.bf16.mxu1 %v4817_v1  ;;  %v4820_v4 = vld [vmem:[#allocation7 + $0x108] sm:$0xff]   ;;  %vm641_vm1 = vcmask 1040384  }
  0x6e   : > { %955 = vst [vmem:[#allocation3 + $0x8] sm:$0xff] %v5208_v0  ;;  %951 = vst [vmem:[#allocation2 + $0x80] sm:$0xff] %v5208_v0  ;;  %4427 = vmatprep.subr.bf16.mxu0 %v4818_v2  ;;  %4300 = vmatpush3.bf16.msra.mxu1 %v4817_v1  ;;  %v4822_v7 = vld [vmem:[#allocation7 + $0x110] sm:$0xff]   ;;  %v4823_v8 = vld [vmem:[#allocation7 + $0x58] sm:$0xff]   ;;  %v380_v9 = vshrl.u32 %v379_v6, 7  ;;  %vm660_vm2 = vcmask 1044480  }
  0x6f   : > { %1052 = vst [vmem:[#allocation3 + $0x90] sm:$0xff] %v5208_v0  ;;  %4428 = vmatpush3.bf16.msra.mxu0 %v4818_v2  ;;  %4301 = vmatprep.subr.bf16.mxu1 %v4819_v3  ;;  %v4824_v10 = vld [vmem:[#allocation7 + $0x118] sm:$0xff]   ;;  %v4825_v11 = vld [vmem:[#allocation7 + $0x60] sm:$0xff]   ;;  %v4827_v15 = vld [vmem:[#allocation7 + $0x68] sm:$0xff]   ;;  %vm661_vm3 = vsmask.f32 4352 }
  0x70   : > { %4429 = vmatprep.subr.bf16.mxu0 %v4820_v4  ;;  %v381_v12 = vsub.s32 0, %v380_v9  ;;  %v4826_v13 = vld [vmem:[#allocation7 + $0x120] sm:$0xff]   ;;  %v385_v14 = vsub.s32 1, %v380_v9  ;;  %v4828_v16 = vld [vmem:[#allocation7 + $0x128] sm:$0xff]   ;;  %v347_v17 = vld [vmem:[%s5434_s14 + $0x10] sm:$0xff]  ;;  %s3916_s15 = sshll.u32 %s5430_s11, 6 }
  0x71   : > { %v348_v18 = vld [vmem:[%s5434_s14 + $0x18] sm:$0xff]  ;;  %v377_v19 = vld [vmem:[%s5984_s1] sm:$0x3]  ;;  %v345_v35 = vld [vmem:[%s5434_s14] sm:$0xff]  ;;  %vm1162_vm6 = vsmask.f32 7424 }
  0x72   : > { %4302 = vmatpush3.bf16.msra.mxu1 %v4819_v3  ;;  %v5449_v20 = vrot.slane %v377_v19, %v381_v12  ;;  %v5451_v21 = vrot.slane %v377_v19, %v385_v14  ;;  %v421_v22 = vld [vmem:[%s5985_s2] sm:$0x3]  ;;  %v352_v28 = vld [vmem:[%s5434_s14 + $0x38] sm:$0xff]  ;;  %v346_v36 = vld [vmem:[%s5434_s14 + $0x8] sm:$0xff]  ;;  %s5846_s12 = scalar_lea.vmem [#allocation13], %s3916_s15  ;;  %s3914_s10 = sshll.u32 %s5430_s11, 5 }
  0x73   : > { %4430 = vmatpush3.bf16.msra.mxu0 %v4820_v4  ;;  %4303 = vmatprep.subr.bf16.mxu1 %v4821_v5  ;;  %v4829_v23 = vld [vmem:[#allocation7 + $0x70] sm:$0xff]   ;;  %v5456_v24 = vrot.slane %v421_v22, %v381_v12  ;;  %v5458_v25 = vrot.slane %v421_v22, %v385_v14  ;;  %v349_v37 = vld [vmem:[%s5434_s14 + $0x20] sm:$0xff]  ;;  %v350_v42 = vld [vmem:[%s5434_s14 + $0x28] sm:$0xff]  ;;  %s5856_s17 = scalar_lea.vmem [#allocation10], %s3914_s10  ;;  %s4118_s20 = sshll.u32 %s5277_s28, 9 }
  0x74   : > { %4431 = vmatprep.subr.bf16.mxu0 %v4822_v7  ;;  %v351_v27 = vld [vmem:[%s5434_s14 + $0x30] sm:$0xff]  ;;  %v391_v30 = vmul.f32 %v5449_v20, %v347_v17  ;;  %v392_v31 = vmul.f32 %v5451_v21, %v348_v18  ;;  %v396_v33 = vmul.f32 %v5451_v21, %v352_v28  ;;  %v4831_v43 = vld [vmem:[#allocation7 + $0x78] sm:$0xff]   ;;  %v389_v44 = vmul.f32 %v5449_v20, %v345_v35  ;;  %v5485_v60 = vld [vmem:[#allocation7] sm:$0xff]   ;;  %s3720_s23 = sshll.u32 %s5856_s17, 4  ;;  %s5871_s30 = scalar_lea.hbm %s5988_s5, %s4118_s20  ;;  %s5865_s23 = int_to_ptr.vmem [resolvable:$true] %s3720_s23 }
  0x75   : > { %v5460_v26 = vld [vmem:[#allocation3] ss:$8 sps:$4 sm:$0xff]   ;;  %v395_v32 = vmul.f32 %v5449_v20, %v351_v27  ;;  %v390_v45 = vmul.f32 %v5451_v21, %v346_v36  ;;  %v393_v46 = vmul.f32 %v5449_v20, %v349_v37  ;;  %v394_v53 = vmul.f32 %v5451_v21, %v350_v42  ;;  %v4832_v55 = vld [vmem:[#allocation7 + $0x138] sm:$0xff]   ;;  %vm5494_vm4 = vmand %vm641_vm1, %vm642_vm0  ;;  %s3697_s9 = scalar_lea.sflag [#allocation6], %s5430_s11  ;;  %s5069_s22 = scalar_lea.vmem %s5865_s23, 512 }
  0x76   : > { %4304 = vmatpush3.bf16.msra.mxu1 %v4821_v5  ;;  %v4830_v29 = vld [vmem:[#allocation7 + $0x130] sm:$0xff]   ;;  %v1166_v34 = vshll.u32 %v5460_v26, 16  ;;  %v435_v38 = vadd.f32 %v5456_v24, %v391_v30  ;;  %v436_v39 = vadd.f32 %v5458_v25, %v392_v31  ;;  %v440_v41 = vadd.f32 %v5458_v25, %v396_v33  ;;  %vm5500_vm5 = vmand %vm660_vm2, %vm661_vm3  ;;  %p5070_p11 = scmp.ne.s32.totalorder %s5865_s23, %s5069_s22  ;;  %p6009_p0 = scmp.ne.s32.totalorder %s6000_s18, 0 }
  0x77   : > { %4432 = vmatpush3.bf16.msra.mxu0 %v4822_v7  ;;  %4305 = vmatprep.subr.bf16.mxu1 %v4823_v8  ;;  %v439_v40 = vadd.f32 %v5456_v24, %v395_v32  ;;  %v1164_v51 = vshrl.u32 %v5460_v26, 16  ;;  %v433_v54 = vadd.f32 %v5456_v24, %v389_v44  ;;  %v434_v61 = vadd.f32 %v5458_v25, %v390_v45  ;;  %v353_v45 = vld [vmem:[%s5434_s14 + $0x40] sm:$0xff]  ;;  %s5209_s13 = smov [#allocation10]  }
  0x78   : > { %4433 = vmatprep.subr.bf16.mxu0 %v4824_v10  ;;  %v467_v47 = vmax.f32 %v435_v38, 0.0  ;;  %v468_v48 = vmax.f32 %v436_v39, 0.0  ;;  %v472_v50 = vmax.f32 %v440_v41, 0.0  ;;  %v5481_v52 = vrot.slane %v1166_v34, 1  ;;  %p5071_p1 = pnand %p5070_p11, %p6009_p0  ;;  %s5073_s15 = sshll.u32 %s5209_s13, 4  ;;  %s5074_s15 = int_to_ptr.vmem [resolvable:$false] %s5073_s15 }
  0x79   : > { %v471_v49 = vmax.f32 %v439_v40, 0.0  ;;  %v437_v62 = vadd.f32 %v5456_v24, %v393_v46  ;;  %v438_v63 = vadd.f32 %v5458_v25, %v394_v53  ;;  %v465_v0 = vmax.f32 %v433_v54, 0.0  ;;  %v354_v46 = vld [vmem:[%s5434_s14 + $0x48] sm:$0xff]  ;;  %v355_v53 = vld [vmem:[%s5434_s14 + $0x50] sm:$0xff]  ;;  %v356_v54 = vld [vmem:[%s5434_s14 + $0x58] sm:$0xff]  ;;  %s5075_s10 = scalar_lea.vmem %s5074_s15, 1024  ;;  %p5076_p7 = scmp.lt.s32.totalorder %s5865_s23, %s5074_s15 }
  0x7a   : > { %4306 = vmatpush3.bf16.msra.mxu1 %v4823_v8  ;;  %v679_v56 = vpack.c.bf16 %v467_v47, %v467_v47  ;;  %v680_v57 = vpack.c.bf16 %v468_v48, %v468_v48  ;;  %v682_v59 = vpack.c.bf16 %v472_v50, %v472_v50  ;;  %p5072_p3 = pneg %p5071_p1  ;;  %p5077_p9 = scmp.lt.s32.totalorder %s5075_s10, %s5069_s22 }
  0x7b   : > { %4434 = vmatpush3.bf16.msra.mxu0 %v4824_v10  ;;  %4307 = vmatprep.subr.bf16.mxu1 %v4825_v11  ;;  %v681_v58 = vpack.c.bf16 %v471_v49, %v471_v49  ;;  %v469_v12 = vmax.f32 %v437_v62, 0.0  ;;  %v470_v17 = vmax.f32 %v438_v63, 0.0  ;;  %v497_v18 = vpack.c.bf16 %v465_v0, %v465_v0 }
  0x7c   : > { %4435 = vmatprep.subr.bf16.mxu0 %v4826_v13  ;;  %v696_v1 = vshrl.u32 %v679_v56, 16  ;;  %v699_v2 = vshll.u32 %v679_v56, 16  ;;  %v703_v3 = vshrl.u32 %v680_v57, 16  ;;  %v706_v4 = vshll.u32 %v680_v57, 16  ;;  %p5078_p12 = por %p5077_p9, %p5076_p7 }
  0x7d   : > { %v710_v5 = vshrl.u32 %v681_v58, 16  ;;  %v713_v6 = vshll.u32 %v681_v58, 16  ;;  %v717_v7 = vshrl.u32 %v682_v59, 16  ;;  %v720_v8 = vshll.u32 %v682_v59, 16 }
  0x7e   : > { %4308 = vmatpush3.bf16.msra.mxu1 %v4825_v11  ;;  %v698_v9 = vrot.slane %v696_v1, 7  ;;  %v705_v10 = vrot.slane %v703_v3, 7  ;;  %v466_v11 = vmax.f32 %v434_v61, 0.0  ;;  %v499_v28 = vpack.c.bf16 %v469_v12, %v469_v12  ;;  %p5079_p2 = pnand %p5078_p12, %p5072_p3 }
  0x7f   : > { %4436 = vmatpush3.bf16.msra.mxu0 %v4826_v13  ;;  %4309 = vmatprep.subr.bf16.mxu1 %v4827_v15  ;;  %v5490_v13 = vld [vmem:[#allocation7 + $0x140] sm:$0xff]   ;;  %v500_v31 = vpack.c.bf16 %v470_v17, %v470_v17  ;;  %v514_v32 = vshrl.u32 %v497_v18, 16  ;;  %v517_v35 = vshll.u32 %v497_v18, 16  ;;  %v397_v62 = vmul.f32 %v5449_v20, %v353_v45 }
  0x80   : > { %4437 = vmatprep.subr.bf16.mxu0 %v4828_v16  ;;  %v701_v22 = vor.u32 %v699_v2, %v698_v9  ;;  %v498_v27 = vpack.c.bf16 %v466_v11, %v466_v11  ;;  %v528_v56 = vshrl.u32 %v499_v28, 16  ;;  %v531_v57 = vshll.u32 %v499_v28, 16  ;;  %v360_v9 = vld [vmem:[%s5434_s14 + $0x78] sm:$0xff] }
  0x81   : > { %v516_v49 = vrot.slane %v514_v32, 7  ;;  %v535_v58 = vshrl.u32 %v500_v31, 16  ;;  %v538_v61 = vshll.u32 %v500_v31, 16  ;;  %v398_v63 = vmul.f32 %v5451_v21, %v354_v46 }
  0x82   : > { %4310 = vmatpush3.bf16.msra.mxu1 %v4827_v15  ;;  %v712_v15 = vrot.slane %v710_v5, 7  ;;  %v823_v33 = vsel %vm5494_vm4, 0, %v701_v22  ;;  %v521_v36 = vshrl.u32 %v498_v27, 16  ;;  %v530_v1 = vrot.slane %v528_v56, 7 }
  0x83   : > { %4438 = vmatpush3.bf16.msra.mxu0 %v4828_v16  ;;  %4311 = vmatprep.subr.bf16.mxu1 %v4829_v23  ;;  %v719_v16 = vrot.slane %v717_v7, 7  ;;  %v839_v37 = vsel %vm5500_vm5, %v823_v33, 0  ;;  %v519_v59 = vor.u32 %v517_v35, %v516_v49  ;;  %v537_v2 = vrot.slane %v535_v58, 7 }
  0x84   : > { %4439 = vmatprep.subr.bf16.mxu0 %v4830_v29  ;;  %v523_v50 = vrot.slane %v521_v36, 7  ;;  %v399_v3 = vmul.f32 %v5449_v20, %v355_v53  ;;  %v441_v5 = vadd.f32 %v5456_v24, %v397_v62  ;;  %v400_v7 = vmul.f32 %v5451_v21, %v356_v54 }
  0x85   : > { %v722_v30 = vor.u32 %v720_v8, %v719_v16  ;;  %v359_v8 = vld [vmem:[%s5434_s14 + $0x70] sm:$0xff]  ;;  %v533_v11 = vor.u32 %v531_v57, %v530_v1  ;;  %v540_v12 = vor.u32 %v538_v61, %v537_v2  ;;  %v1169_v17 = vor.u32 %v5481_v52, %v1164_v51 }
  0x86   : > { %4312 = vmatpush3.bf16.msra.mxu1 %v4829_v23  ;;  %v708_v23 = vor.u32 %v706_v4, %v705_v10  ;;  %v644_v4 = vsel %vm5494_vm4, 0, %v519_v59  ;;  %v357_v10 = vld [vmem:[%s5434_s14 + $0x60] sm:$0xff]  ;;  %v473_v22 = vmax.f32 %v441_v5, 0.0  ;;  %v443_v26 = vadd.f32 %v5456_v24, %v399_v3 }
  0x87   : > { %4440 = vmatpush3.bf16.msra.mxu0 %v4830_v29  ;;  %4313 = vmatprep.subr.bf16.mxu1 %v4831_v43  ;;  %v715_v29 = vor.u32 %v713_v6, %v712_v15  ;;  %v826_v40 = vsel %vm5494_vm4, 0, %v722_v30  ;;  %v442_v6 = vadd.f32 %v5458_v25, %v398_v63  ;;  %v663_v16 = vsel %vm5500_vm5, %v644_v4, 0 }
  0x88   : > { %4441 = vmatprep.subr.bf16.mxu0 %v4832_v55  ;;  %v824_v34 = vsel %vm5494_vm4, 0, %v708_v23  ;;  %v842_v44 = vsel %vm5500_vm5, %v826_v40, 0  ;;  %v646_v28 = vsel %vm5494_vm4, 0, %v533_v11  ;;  %v501_v33 = vpack.c.bf16 %v473_v22, %v473_v22 }
  0x89   : > { %v840_v38 = vsel %vm5500_vm5, %v824_v34, 0  ;;  %v825_v39 = vsel %vm5494_vm4, 0, %v715_v29  ;;  %v474_v23 = vmax.f32 %v442_v6, 0.0  ;;  %v647_v29 = vsel %vm5494_vm4, 0, %v540_v12 }
  0x8a   : > { %4314 = vmatpush3.bf16.msra.mxu1 %v4831_v43  ;;  %v3933_v41 = vcombine.low %v839_v37, %v840_v38  ;;  %v3934_v42 = vcombine.high %v839_v37, %v840_v38  ;;  %v841_v43 = vsel %vm5500_vm5, %v825_v39, 0  ;;  %v444_v51 = vadd.f32 %v5458_v25, %v400_v7 }
  0x8b   : > { %4442 = vmatpush3.bf16.msra.mxu0 %v4832_v55  ;;  %4331 = vmatprep.subr.bf16.mxu1 %v5485_v60  ;;  %v3935_v47 = vcombine.low %v841_v43, %v842_v44  ;;  %v3936_v48 = vcombine.high %v841_v43, %v842_v44  ;;  %v524_v55 = vshll.u32 %v498_v27, 16  ;;  %v358_v27 = vld [vmem:[%s5434_s14 + $0x68] sm:$0xff]  ;;  %v502_v34 = vpack.c.bf16 %v474_v23, %v474_v23 }
  0x8c   : > { %4459 = vmatprep.subr.bf16.mxu0 %v5490_v13  ;;  %1036 = vst [vmem:[#allocation3 + $0x10] sm:$0xff] %v3933_v41  ;;  %1037 = vst [vmem:[#allocation3 + $0x18] sm:$0xff] %v3934_v42  ;;  %v403_v35 = vmul.f32 %v5449_v20, %v359_v8  ;;  %v404_v36 = vmul.f32 %v5451_v21, %v360_v9  ;;  %v401_v37 = vmul.f32 %v5449_v20, %v357_v10 }
  0x8d   : > { %1038 = vst [vmem:[#allocation3 + $0x20] sm:$0xff] %v3935_v47  ;;  %1039 = vst [vmem:[#allocation3 + $0x28] sm:$0xff] %v3936_v48  ;;  %v526_v0 = vor.u32 %v524_v55, %v523_v50  ;;  %v402_v38 = vmul.f32 %v5451_v21, %v358_v27  ;;  %v665_v41 = vsel %vm5500_vm5, %v646_v28, 0  ;;  %v666_v42 = vsel %vm5500_vm5, %v647_v29, 0  ;;  %v361_v47 = vld [vmem:[%s5434_s14 + $0x80] sm:$0xff]  ;;  %v4845_v29 = vld [vmem:[#allocation7 + $0x10] sm:$0xff]  }
  0x8e   : > { %v3919_v44 = vcombine.low %v665_v41, %v666_v42  ;;  %v3920_v45 = vcombine.high %v665_v41, %v666_v42  ;;  %v542_v46 = vshrl.u32 %v501_v33, 16  ;;  %v545_v49 = vshll.u32 %v501_v33, 16 }
  0x8f   : > { %v645_v15 = vsel %vm5494_vm4, 0, %v526_v0  ;;  %v549_v50 = vshrl.u32 %v502_v34, 16  ;;  %v552_v53 = vshll.u32 %v502_v34, 16  ;;  %v475_v56 = vmax.f32 %v443_v26, 0.0  ;;  %v4841_v0 = vld [vmem:[#allocation7 + $0x8] sm:$0xff]  }
  0x90   : > { %v664_v18 = vsel %vm5500_vm5, %v645_v15, 0  ;;  %937 = vst [vmem:[#allocation2 + $0x10] sm:$0xff] %v3919_v44  ;;  %938 = vst [vmem:[#allocation2 + $0x18] sm:$0xff] %v3920_v45  ;;  %v544_v55 = vrot.slane %v542_v46, 7  ;;  %v476_v57 = vmax.f32 %v444_v51, 0.0  ;;  %v5569_v62 = vmul.f32 %v5449_v20, %v361_v47  ;;  %v4849_v44 = vld [vmem:[#allocation7 + $0x18] sm:$0xff]  }
  0x91   : > { %v3917_v30 = vcombine.low %v663_v16, %v664_v18  ;;  %v3918_v31 = vcombine.high %v663_v16, %v664_v18  ;;  %v551_v61 = vrot.slane %v549_v50, 7  ;;  %v683_v1 = vpack.c.bf16 %v475_v56, %v475_v56 }
  0x92   : > { %v547_v63 = vor.u32 %v545_v49, %v544_v55  ;;  %v684_v2 = vpack.c.bf16 %v476_v57, %v476_v57  ;;  %v447_v7 = vadd.f32 %v5456_v24, %v403_v35  ;;  %v448_v8 = vadd.f32 %v5458_v25, %v404_v36  ;;  %v362_v49 = vld [vmem:[%s5434_s14 + $0x88] sm:$0xff]  ;;  %v363_v57 = vld [vmem:[%s5434_s14 + $0x90] sm:$0xff] }
  0x93   : > { %v4834_v32 = vld [vmem:[#allocation3 + $0x10] ss:$8 sps:$4 sm:$0xff]   ;;  %935 = vst [vmem:[#allocation2] sm:$0xff] %v3917_v30  ;;  %936 = vst [vmem:[#allocation2 + $0x8] sm:$0xff] %v3918_v31  ;;  %v554_v6 = vor.u32 %v552_v53, %v551_v61  ;;  %v724_v10 = vshrl.u32 %v683_v1, 16  ;;  %v727_v11 = vshll.u32 %v683_v1, 16  ;;  %v445_v33 = vadd.f32 %v5456_v24, %v401_v37 }
  0x94   : > { %v5553_v52 = vld [vmem:[#allocation3 + $0x20] ss:$8 sps:$4 sm:$0xff]   ;;  %v1171_v39 = vshll.u32 %v4834_v32, 16  ;;  %v1175_v40 = vshrl.u32 %v4834_v32, 16  ;;  %v648_v9 = vsel %vm5494_vm4, 0, %v547_v63  ;;  %v731_v12 = vshrl.u32 %v684_v2, 16 }
  0x95   : > { %v1179_v43 = vshll.u32 %v5553_v52, 16  ;;  %v1183_v3 = vshrl.u32 %v5553_v52, 16  ;;  %v667_v18 = vsel %vm5500_vm5, %v648_v9, 0  ;;  %v726_v23 = vrot.slane %v724_v10, 7  ;;  %v364_v9 = vld [vmem:[%s5434_s14 + $0x98] sm:$0xff] }
  0x96   : > { %v1173_v48 = vrot.slane %v1171_v39, 1  ;;  %v733_v27 = vrot.slane %v731_v12, 7  ;;  %v734_v28 = vshll.u32 %v684_v2, 16  ;;  %v479_v35 = vmax.f32 %v447_v7, 0.0 }
  0x97   : > { %v5565_v54 = vrot.slane %v1179_v43, 1  ;;  %v4838_v30 = vld [vmem:[#allocation2 + $0x10] ss:$8 sps:$4 sm:$0xff]   ;;  %v729_v26 = vor.u32 %v727_v11, %v726_v23  ;;  %v477_v41 = vmax.f32 %v445_v33, 0.0  ;;  %v367_v33 = vld [vmem:[%s5434_s14 + $0xb0] sm:$0xff] }
  0x98   : > { %v1174_v58 = vsel %vm1162_vm6, %v1169_v17, %v1173_v48  ;;  %v1177_v59 = vor.u32 %v1175_v40, %v1173_v48  ;;  %v649_v17 = vsel %vm5494_vm4, 0, %v554_v6  ;;  %v736_v51 = vor.u32 %v734_v28, %v733_v27  ;;  %v4857_v27 = vld [vmem:[#allocation7 + $0x28] sm:$0xff]  }
  0x99   : > { %4315 = vmatprep.mubr.bf16.mxu1 %v1174_v58  ;;  %v668_v22 = vsel %vm5500_vm5, %v649_v17, 0  ;;  %v2170_v36 = vshll.u32 %v4838_v30, 16  ;;  %v2174_v39 = vshrl.u32 %v4838_v30, 16  ;;  %v480_v40 = vmax.f32 %v448_v8, 0.0  ;;  %v4853_v58 = vld [vmem:[#allocation7 + $0x20] sm:$0xff]   ;;  %v4842_v28 = vld [vmem:[#allocation7 + $0x148] sm:$0xff]  }
  0x9a   : > { %v1182_v4 = vsel %vm1162_vm6, %v1177_v59, %v5565_v54  ;;  %v4837_v5 = vld [vmem:[#allocation2] ss:$8 sps:$4 sm:$0xff]   ;;  %v3921_v31 = vcombine.low %v667_v18, %v668_v22  ;;  %v3922_v32 = vcombine.high %v667_v18, %v668_v22  ;;  %v827_v43 = vsel %vm5494_vm4, 0, %v729_v26  ;;  %v4871_v14 = vld [vmem:[#allocation2 + $0x14] ss:$8 sps:$4 sm:$0xff]  }
  0x9b   : > { %4316 = vmatmul.mubr.bf16.vlgmr.msra.gmra.mrb[0].mxu1 %v1182_v4  ;;  %v2163_v15 = vshrl.u32 %v4837_v5, 16  ;;  %v2165_v16 = vshll.u32 %v4837_v5, 16  ;;  %v828_v37 = vsel %vm5494_vm4, 0, %v736_v51  ;;  %v2172_v45 = vrot.slane %v2170_v36, 1 }
  0x9c   : > { %4332 = vmatpush3.bf16.msra.mxu1 %v5485_v60  ;;  %v446_v60 = vadd.f32 %v5458_v25, %v402_v38  ;;  %939 = vst [vmem:[#allocation2 + $0x20] sm:$0xff] %v3921_v31  ;;  %940 = vst [vmem:[#allocation2 + $0x28] sm:$0xff] %v3922_v32  ;;  %v685_v38 = vpack.c.bf16 %v479_v35, %v479_v35  ;;  %v843_v46 = vsel %vm5500_vm5, %v827_v43, 0  ;;  %v844_v47 = vsel %vm5500_vm5, %v828_v37, 0 }
  0x9d   : > { %4333 = vmatprep.subr.bf16.mxu1 %v4841_v0  ;;  %v2167_v34 = vrot.slane %v2165_v16, 1  ;;  %v686_v48 = vpack.c.bf16 %v480_v40, %v480_v40  ;;  %v3937_v50 = vcombine.low %v843_v46, %v844_v47  ;;  %v3938_v53 = vcombine.high %v843_v46, %v844_v47 }
  0x9e   : > { %v738_v55 = vshrl.u32 %v685_v38, 16  ;;  %v741_v56 = vshll.u32 %v685_v38, 16  ;;  %v478_v1 = vmax.f32 %v446_v60, 0.0  ;;  %v503_v2 = vpack.c.bf16 %v477_v41, %v477_v41 }
  0x9f   : > { %v2168_v42 = vor.u32 %v2167_v34, %v2163_v15  ;;  %v745_v61 = vshrl.u32 %v686_v48, 16  ;;  %v748_v63 = vshll.u32 %v686_v48, 16  ;;  %1040 = vst [vmem:[#allocation3 + $0x30] sm:$0xff] %v3937_v50  ;;  %1041 = vst [vmem:[#allocation3 + $0x38] sm:$0xff] %v3938_v53  ;;  %v406_v4 = vmul.f32 %v5451_v21, %v362_v49  ;;  %v4847_v48 = vld [vmem:[#allocation7 + $0x150] sm:$0xff]   ;;  %v368_v50 = vld [vmem:[%s5434_s14 + $0xb8] sm:$0xff] }
  0xa0   : > { %4334 = vmatpush3.bf16.msra.mxu1 %v4841_v0  ;;  %v740_v0 = vrot.slane %v738_v55, 7  ;;  %v2176_v5 = vor.u32 %v2174_v39, %v2172_v45  ;;  %v5602_v6 = vor.u32 %v1183_v3, %v5565_v54  ;;  %v449_v8 = vadd.f32 %v5456_v24, %v5569_v62 }
  0xa1   : > { %4335 = vmatprep.subr.bf16.mxu1 %v4845_v29  ;;  %v2173_v59 = vsel %vm1162_vm6, %v2168_v42, %v2172_v45  ;;  %v747_v7 = vrot.slane %v745_v61, 7  ;;  %v504_v12 = vpack.c.bf16 %v478_v1, %v478_v1  ;;  %v450_v15 = vadd.f32 %v5458_v25, %v406_v4  ;;  %v366_v1 = vld [vmem:[%s5434_s14 + $0xa8] sm:$0xff] }
  0xa2   : > { %4443 = vmatprep.mubr.bf16.mxu0 %v2173_v59  ;;  %v743_v11 = vor.u32 %v741_v56, %v740_v0  ;;  %v407_v16 = vmul.f32 %v5449_v20, %v363_v57  ;;  %v556_v18 = vshrl.u32 %v503_v2, 16  ;;  %v559_v22 = vshll.u32 %v503_v2, 16 }
  0xa3   : > { %v5607_v10 = vld [vmem:[#allocation2 + $0x20] ss:$8 sps:$4 sm:$0xff]   ;;  %v750_v17 = vor.u32 %v748_v63, %v747_v7  ;;  %v481_v52 = vmax.f32 %v449_v8, 0.0  ;;  %v563_v3 = vshrl.u32 %v504_v12, 16  ;;  %v566_v23 = vshll.u32 %v504_v12, 16 }
  0xa4   : > { %4336 = vmatpush3.bf16.msra.mxu1 %v4845_v29  ;;  %v2178_v54 = vshll.u32 %v5607_v10, 16  ;;  %v829_v62 = vsel %vm5494_vm4, 0, %v743_v11  ;;  %v558_v31 = vrot.slane %v556_v18, 7  ;;  %v408_v32 = vmul.f32 %v5451_v21, %v364_v9  ;;  %v4865_v7 = vld [vmem:[#allocation7 + $0x38] sm:$0xff]  }
  0xa5   : > { %4337 = vmatprep.subr.bf16.mxu1 %v4849_v44  ;;  %v830_v29 = vsel %vm5494_vm4, 0, %v750_v17  ;;  %v845_v30 = vsel %vm5500_vm5, %v829_v62, 0  ;;  %v565_v26 = vrot.slane %v563_v3, 7  ;;  %v482_v51 = vmax.f32 %v450_v15, 0.0  ;;  %v369_v15 = vld [vmem:[%s5434_s14 + $0xc0] sm:$0xff]  ;;  %v4850_v18 = vld [vmem:[#allocation7 + $0x158] sm:$0xff]  }
  0xa6   : > { %v5620_v60 = vrot.slane %v2178_v54, 1  ;;  %v846_v34 = vsel %vm5500_vm5, %v830_v29, 0  ;;  %v4843_v35 = vld [vmem:[#allocation3 + $0x30] ss:$8 sps:$4 sm:$0xff]   ;;  %v561_v40 = vor.u32 %v559_v22, %v558_v31  ;;  %v505_v41 = vpack.c.bf16 %v481_v52, %v481_v52 }
  0xa7   : > { %v3939_v36 = vcombine.low %v845_v30, %v846_v34  ;;  %v3940_v39 = vcombine.high %v845_v30, %v846_v34  ;;  %v568_v43 = vor.u32 %v566_v23, %v565_v26  ;;  %v506_v37 = vpack.c.bf16 %v482_v51, %v482_v51  ;;  %v5647_v54 = vld [vmem:[#allocation7 + $0x80] sm:$0xff]   ;;  %v370_v51 = vld [vmem:[%s5434_s14 + $0xc8] sm:$0xff] }
  0xa8   : > { %4338 = vmatpush3.bf16.msra.mxu1 %v4849_v44  ;;  %v2181_v42 = vsel %vm1162_vm6, %v2176_v5, %v5620_v60  ;;  %v411_v38 = vmul.f32 %v5449_v20, %v367_v33  ;;  %v4861_v44 = vld [vmem:[#allocation7 + $0x30] sm:$0xff]   ;;  %v1187_v45 = vshll.u32 %v4843_v35, 16  ;;  %v1191_v46 = vshrl.u32 %v4843_v35, 16  ;;  %v4855_v26 = vld [vmem:[#allocation7 + $0x160] sm:$0xff]  }
  0xa9   : > { %4339 = vmatprep.subr.bf16.mxu1 %v4853_v58  ;;  %4444 = vmatmul.mubr.bf16.vlgmr.msra.gmra.mrb[0].mxu0 %v2181_v42  ;;  %1042 = vst [vmem:[#allocation3 + $0x40] sm:$0xff] %v3939_v36  ;;  %1043 = vst [vmem:[#allocation3 + $0x48] sm:$0xff] %v3940_v39  ;;  %v650_v47 = vsel %vm5494_vm4, 0, %v561_v40  ;;  %v570_v49 = vshrl.u32 %v505_v41, 16  ;;  %v651_v53 = vsel %vm5494_vm4, 0, %v568_v43  ;;  %v573_v56 = vshll.u32 %v505_v41, 16 }
  0xaa   : > { %4460 = vmatpush3.bf16.msra.mxu0 %v5490_v13  ;;  %v669_v55 = vsel %vm5500_vm5, %v650_v47, 0  ;;  %v577_v57 = vshrl.u32 %v506_v37, 16  ;;  %v1189_v59 = vrot.slane %v1187_v45, 1  ;;  %v670_v61 = vsel %vm5500_vm5, %v651_v53, 0 }
  0xab   : > { %4461 = vmatprep.subr.bf16.mxu0 %v4842_v28  ;;  %v572_v63 = vrot.slane %v570_v49, 7  ;;  %v580_v0 = vshll.u32 %v506_v37, 16  ;;  %v3923_v13 = vcombine.low %v669_v55, %v670_v61  ;;  %v3924_v2 = vcombine.high %v669_v55, %v670_v61 }
  0xac   : > { %4340 = vmatpush3.bf16.msra.mxu1 %v4853_v58  ;;  %v365_v58 = vld [vmem:[%s5434_s14 + $0xa0] sm:$0xff]  ;;  %v579_v4 = vrot.slane %v577_v57, 7  ;;  %v451_v5 = vadd.f32 %v5456_v24, %v407_v16  ;;  %v1190_v8 = vsel %vm1162_vm6, %v5602_v6, %v1189_v59  ;;  %v2182_v9 = vshrl.u32 %v5607_v10, 16 }
  0xad   : > { %4341 = vmatprep.subr.bf16.mxu1 %v4857_v27  ;;  %v575_v11 = vor.u32 %v573_v56, %v572_v63  ;;  %v452_v12 = vadd.f32 %v5458_v25, %v408_v32  ;;  %4319 = vmatprep.mubr.bf16.mxu1 %v1190_v8  ;;  %941 = vst [vmem:[#allocation2 + $0x30] sm:$0xff] %v3923_v13  ;;  %942 = vst [vmem:[#allocation2 + $0x38] sm:$0xff] %v3924_v2 }
  0xae   : > { %4462 = vmatpush3.bf16.msra.mxu0 %v4842_v28  ;;  %v582_v17 = vor.u32 %v580_v0, %v579_v4  ;;  %v483_v22 = vmax.f32 %v451_v5, 0.0  ;;  %v412_v16 = vmul.f32 %v5451_v21, %v368_v50  ;;  %v455_v52 = vadd.f32 %v5456_v24, %v411_v38  ;;  %v4858_v0 = vld [vmem:[#allocation7 + $0x168] sm:$0xff]  }
  0xaf   : > { %v1193_v6 = vor.u32 %v1191_v46, %v1189_v59  ;;  %4463 = vmatprep.subr.bf16.mxu0 %v4847_v48  ;;  %v652_v10 = vsel %vm5494_vm4, 0, %v575_v11  ;;  %v484_v62 = vmax.f32 %v452_v12, 0.0  ;;  %v409_v3 = vmul.f32 %v5449_v20, %v365_v58 }
  0xb0   : > { %4342 = vmatpush3.bf16.msra.mxu1 %v4857_v27  ;;  %v5652_v23 = vld [vmem:[#allocation3 + $0x40] ss:$8 sps:$4 sm:$0xff]   ;;  %v687_v27 = vpack.c.bf16 %v483_v22, %v483_v22  ;;  %v456_v28 = vadd.f32 %v5458_v25, %v412_v16  ;;  %v410_v29 = vmul.f32 %v5451_v21, %v366_v1  ;;  %v413_v30 = vmul.f32 %v5449_v20, %v369_v15 }
  0xb1   : > { %4343 = vmatprep.subr.bf16.mxu1 %v4861_v44  ;;  %v653_v31 = vsel %vm5494_vm4, 0, %v582_v17  ;;  %v671_v32 = vsel %vm5500_vm5, %v652_v10, 0  ;;  %v688_v33 = vpack.c.bf16 %v484_v62, %v484_v62  ;;  %v487_v34 = vmax.f32 %v455_v52, 0.0  ;;  %v4863_v10 = vld [vmem:[#allocation7 + $0x170] sm:$0xff]  }
  0xb2   : > { %v1195_v35 = vshll.u32 %v5652_v23, 16  ;;  %v672_v36 = vsel %vm5500_vm5, %v653_v31, 0  ;;  %4464 = vmatpush3.bf16.msra.mxu0 %v4847_v48  ;;  %v752_v39 = vshrl.u32 %v687_v27, 16  ;;  %v755_v40 = vshll.u32 %v687_v27, 16 }
  0xb3   : > { %v3925_v41 = vcombine.low %v671_v32, %v672_v36  ;;  %v3926_v42 = vcombine.high %v671_v32, %v672_v36  ;;  %4465 = vmatprep.subr.bf16.mxu0 %v4850_v18  ;;  %v759_v43 = vshrl.u32 %v688_v33, 16  ;;  %v762_v37 = vshll.u32 %v688_v33, 16  ;;  %v372_v36 = vld [vmem:[%s5434_s14 + $0xd8] sm:$0xff] }
  0xb4   : > { %4344 = vmatpush3.bf16.msra.mxu1 %v4861_v44  ;;  %v5665_v38 = vrot.slane %v1195_v35, 1  ;;  %v754_v44 = vrot.slane %v752_v39, 7  ;;  %v1199_v45 = vshrl.u32 %v5652_v23, 16  ;;  %v488_v46 = vmax.f32 %v456_v28, 0.0  ;;  %v4846_v47 = vld [vmem:[#allocation2 + $0x30] ss:$8 sps:$4 sm:$0xff]  }
  0xb5   : > { %4345 = vmatprep.subr.bf16.mxu1 %v4865_v7  ;;  %v2184_v49 = vor.u32 %v2182_v9, %v5620_v60  ;;  %943 = vst [vmem:[#allocation2 + $0x40] sm:$0xff] %v3925_v41  ;;  %944 = vst [vmem:[#allocation2 + $0x48] sm:$0xff] %v3926_v42  ;;  %v689_v48 = vpack.c.bf16 %v487_v34, %v487_v34  ;;  %v453_v50 = vadd.f32 %v5456_v24, %v409_v3 }
  0xb6   : > { %v414_v53 = vmul.f32 %v5451_v21, %v370_v51  ;;  %v1198_v55 = vsel %vm1162_vm6, %v1193_v6, %v5665_v38  ;;  %4466 = vmatpush3.bf16.msra.mxu0 %v4850_v18  ;;  %v757_v56 = vor.u32 %v755_v40, %v754_v44  ;;  %v761_v57 = vrot.slane %v759_v43, 7  ;;  %v371_v6 = vld [vmem:[%s5434_s14 + $0xd0] sm:$0xff]  ;;  %v4866_v43 = vld [vmem:[#allocation7 + $0x178] sm:$0xff]  }
  0xb7   : > { %v454_v58 = vadd.f32 %v5458_v25, %v410_v29  ;;  %4320 = vmatmul.mubr.bf16.gmra.mrb[4].mxu1 %v1198_v55  ;;  %v2186_v59 = vshll.u32 %v4846_v47, 16  ;;  %v690_v61 = vpack.c.bf16 %v488_v46, %v488_v46  ;;  %v766_v63 = vshrl.u32 %v689_v48, 16  ;;  %4467 = vmatprep.subr.bf16.mxu0 %v4855_v26  ;;  %v375_v55 = vld [vmem:[%s5434_s14 + $0xf0] sm:$0xff] }
  0xb8   : > { %4346 = vmatpush3.bf16.msra.mxu1 %v4865_v7  ;;  %v457_v60 = vadd.f32 %v5456_v24, %v413_v30  ;;  %v764_v1 = vor.u32 %v762_v37, %v761_v57  ;;  %v831_v13 = vsel %vm5494_vm4, 0, %v757_v56  ;;  %v769_v2 = vshll.u32 %v689_v48, 16 }
  0xb9   : > { %4363 = vmatprep.subr.bf16.mxu1 %v5647_v54  ;;  %v485_v4 = vmax.f32 %v453_v50, 0.0  ;;  %v2188_v5 = vrot.slane %v2186_v59, 1  ;;  %v847_v7 = vsel %vm5500_vm5, %v831_v13, 0  ;;  %v768_v8 = vrot.slane %v766_v63, 7  ;;  %v5712_v13 = vld [vmem:[#allocation7 + $0x180] sm:$0xff]  }
  0xba   : > { %v773_v9 = vshrl.u32 %v690_v61, 16  ;;  %v2190_v11 = vshrl.u32 %v4846_v47, 16  ;;  %v832_v12 = vsel %vm5494_vm4, 0, %v764_v1  ;;  %v486_v15 = vmax.f32 %v454_v58, 0.0  ;;  %4468 = vmatpush3.bf16.msra.mxu0 %v4855_v26 }
  0xbb   : > { %v507_v17 = vpack.c.bf16 %v485_v4, %v485_v4  ;;  %v2189_v18 = vsel %vm1162_vm6, %v2184_v49, %v2188_v5  ;;  %v848_v22 = vsel %vm5500_vm5, %v832_v12, 0  ;;  %v771_v16 = vor.u32 %v769_v2, %v768_v8  ;;  %4469 = vmatprep.subr.bf16.mxu0 %v4858_v0  ;;  %v373_v4 = vld [vmem:[%s5434_s14 + $0xe0] sm:$0xff] }
  0xbc   : > { %v776_v52 = vshll.u32 %v690_v61, 16  ;;  %4447 = vmatprep.mubr.bf16.mxu0 %v2189_v18  ;;  %v5686_v62 = vld [vmem:[#allocation2 + $0x40] ss:$8 sps:$4 sm:$0xff]   ;;  %v3941_v3 = vcombine.low %v847_v7, %v848_v22  ;;  %v3942_v27 = vcombine.high %v847_v7, %v848_v22  ;;  %v508_v28 = vpack.c.bf16 %v486_v15, %v486_v15 }
  0xbd   : > { %v458_v29 = vadd.f32 %v5458_v25, %v414_v53  ;;  %v775_v30 = vrot.slane %v773_v9, 7  ;;  %v833_v31 = vsel %vm5494_vm4, 0, %v771_v16  ;;  %v584_v32 = vshrl.u32 %v507_v17, 16  ;;  %v376_v61 = vld [vmem:[%s5434_s14 + $0xf8] sm:$0xff] }
  0xbe   : > { %v587_v33 = vshll.u32 %v507_v17, 16  ;;  %v2192_v34 = vor.u32 %v2190_v11, %v2188_v5  ;;  %v2194_v26 = vshll.u32 %v5686_v62, 16  ;;  %1044 = vst [vmem:[#allocation3 + $0x50] sm:$0xff] %v3941_v3  ;;  %1045 = vst [vmem:[#allocation3 + $0x58] sm:$0xff] %v3942_v27  ;;  %v591_v51 = vshrl.u32 %v508_v28, 16  ;;  %4470 = vmatpush3.bf16.msra.mxu0 %v4858_v0 }
  0xbf   : > { %v594_v35 = vshll.u32 %v508_v28, 16  ;;  %v778_v39 = vor.u32 %v776_v52, %v775_v30  ;;  %v849_v40 = vsel %vm5500_vm5, %v833_v31, 0  ;;  %v586_v41 = vrot.slane %v584_v32, 7  ;;  %4471 = vmatprep.subr.bf16.mxu0 %v4863_v10  ;;  %v374_v31 = vld [vmem:[%s5434_s14 + $0xe8] sm:$0xff] }
  0xc0   : > { %v489_v42 = vmax.f32 %v457_v60, 0.0  ;;  %v5695_v37 = vrot.slane %v2194_v26, 1  ;;  %v593_v44 = vrot.slane %v591_v51, 7  ;;  %v490_v46 = vmax.f32 %v458_v29, 0.0 }
  0xc1   : > { %v415_v47 = vmul.f32 %v5449_v20, %v371_v6  ;;  %v834_v49 = vsel %vm5494_vm4, 0, %v778_v39  ;;  %v589_v48 = vor.u32 %v587_v33, %v586_v41  ;;  %v416_v53 = vmul.f32 %v5451_v21, %v372_v36 }
  0xc2   : > { %v509_v50 = vpack.c.bf16 %v489_v42, %v489_v42  ;;  %v2197_v56 = vsel %vm1162_vm6, %v2192_v34, %v5695_v37  ;;  %v1201_v57 = vor.u32 %v1199_v45, %v5665_v38  ;;  %v850_v58 = vsel %vm5500_vm5, %v834_v49, 0  ;;  %4472 = vmatpush3.bf16.msra.mxu0 %v4863_v10 }
  0xc3   : > { %v596_v59 = vor.u32 %v594_v35, %v593_v44  ;;  %4448 = vmatmul.mubr.bf16.gmra.mrb[4].mxu0 %v2197_v56  ;;  %v3943_v63 = vcombine.low %v849_v40, %v850_v58  ;;  %v3944_v60 = vcombine.high %v849_v40, %v850_v58  ;;  %v654_v0 = vsel %vm5494_vm4, 0, %v589_v48  ;;  %4473 = vmatprep.subr.bf16.mxu0 %v4866_v43 }
  0xc4   : > { %v510_v1 = vpack.c.bf16 %v490_v46, %v490_v46  ;;  %v673_v38 = vsel %vm5500_vm5, %v654_v0, 0  ;;  %v598_v45 = vshrl.u32 %v509_v50, 16  ;;  %v601_v2 = vshll.u32 %v509_v50, 16 }
  0xc5   : > { %v655_v23 = vsel %vm5494_vm4, 0, %v596_v59  ;;  %v4851_v5 = vld [vmem:[#allocation3 + $0x50] ss:$8 sps:$4 sm:$0xff]   ;;  %1046 = vst [vmem:[#allocation3 + $0x60] sm:$0xff] %v3943_v63  ;;  %1047 = vst [vmem:[#allocation3 + $0x68] sm:$0xff] %v3944_v60  ;;  %v459_v7 = vadd.f32 %v5456_v24, %v415_v47  ;;  %v460_v8 = vadd.f32 %v5458_v25, %v416_v53  ;;  %v419_v9 = vmul.f32 %v5449_v20, %v375_v55 }
  0xc6   : > { %v420_v11 = vmul.f32 %v5451_v21, %v376_v61  ;;  %v674_v12 = vsel %vm5500_vm5, %v655_v23, 0  ;;  %v600_v15 = vrot.slane %v598_v45, 7  ;;  %v605_v17 = vshrl.u32 %v510_v1, 16  ;;  %4474 = vmatpush3.bf16.msra.mxu0 %v4866_v43 }
  0xc7   : > { %v608_v18 = vshll.u32 %v510_v1, 16  ;;  %v1203_v22 = vshll.u32 %v4851_v5, 16  ;;  %v1207_v16 = vshrl.u32 %v4851_v5, 16  ;;  %v3927_v52 = vcombine.low %v673_v38, %v674_v12  ;;  %4491 = vmatprep.subr.bf16.mxu0 %v5712_v13 }
  0xc8   : > { %v3928_v6 = vcombine.high %v673_v38, %v674_v12  ;;  %v603_v10 = vor.u32 %v601_v2, %v600_v15  ;;  %v607_v3 = vrot.slane %v605_v17, 7  ;;  %v491_v27 = vmax.f32 %v459_v7, 0.0 }
  0xc9   : > { %v492_v28 = vmax.f32 %v460_v8, 0.0  ;;  %v1205_v29 = vrot.slane %v1203_v22, 1  ;;  %945 = vst [vmem:[#allocation2 + $0x50] sm:$0xff] %v3927_v52  ;;  %v463_v30 = vadd.f32 %v5456_v24, %v419_v9  ;;  %v417_v32 = vmul.f32 %v5449_v20, %v373_v4 }
  0xca   : > { %946 = vst [vmem:[#allocation2 + $0x58] sm:$0xff] %v3928_v6  ;;  %v610_v33 = vor.u32 %v608_v18, %v607_v3  ;;  %v656_v34 = vsel %vm5494_vm4, 0, %v603_v10  ;;  %v691_v26 = vpack.c.bf16 %v491_v27, %v491_v27  ;;  %v2198_v36 = vshrl.u32 %v5686_v62, 16 }
  0xcb   : > { %v692_v51 = vpack.c.bf16 %v492_v28, %v492_v28  ;;  %v1206_v35 = vsel %vm1162_vm6, %v1201_v57, %v1205_v29  ;;  %v675_v39 = vsel %vm5500_vm5, %v656_v34, 0  ;;  %v495_v40 = vmax.f32 %v463_v30, 0.0 }
  0xcc   : > { %4323 = vmatprep.mubr.bf16.mxu1 %v1206_v35  ;;  %v5735_v41 = vld [vmem:[#allocation3 + $0x60] ss:$8 sps:$4 sm:$0xff]   ;;  %v1209_v42 = vor.u32 %v1207_v16, %v1205_v29  ;;  %v464_v20 = vadd.f32 %v5458_v25, %v420_v11  ;;  %v418_v43 = vmul.f32 %v5451_v21, %v374_v31  ;;  %v657_v44 = vsel %vm5494_vm4, 0, %v610_v33 }
  0xcd   : > { %v780_v46 = vshrl.u32 %v691_v26, 16  ;;  %v783_v47 = vshll.u32 %v691_v26, 16  ;;  %v787_v49 = vshrl.u32 %v692_v51, 16  ;;  %v1211_v62 = vshll.u32 %v5735_v41, 16 }
  0xce   : > { %v676_v48 = vsel %vm5500_vm5, %v657_v44, 0  ;;  %v790_v50 = vshll.u32 %v692_v51, 16  ;;  %v461_v53 = vadd.f32 %v5456_v24, %v417_v32  ;;  %v496_v21 = vmax.f32 %v464_v20, 0.0 }
  0xcf   : > { %v3929_v55 = vcombine.low %v675_v39, %v676_v48  ;;  %v3930_v56 = vcombine.high %v675_v39, %v676_v48  ;;  %v782_v57 = vrot.slane %v780_v46, 7  ;;  %v789_v58 = vrot.slane %v787_v49, 7 }
  0xd0   : > { %v1213_v59 = vrot.slane %v1211_v62, 1  ;;  %v693_v61 = vpack.c.bf16 %v495_v40, %v495_v40  ;;  %v2200_v60 = vor.u32 %v2198_v36, %v5695_v37  ;;  %v462_v23 = vadd.f32 %v5458_v25, %v418_v43 }
  0xd1   : > { %v4854_v63 = vld [vmem:[#allocation2 + $0x50] ss:$8 sps:$4 sm:$0xff]   ;;  %947 = vst [vmem:[#allocation2 + $0x60] sm:$0xff] %v3929_v55  ;;  %948 = vst [vmem:[#allocation2 + $0x68] sm:$0xff] %v3930_v56  ;;  %v785_v0 = vor.u32 %v783_v47, %v782_v57  ;;  %v792_v1 = vor.u32 %v790_v50, %v789_v58  ;;  %v694_v45 = vpack.c.bf16 %v496_v21, %v496_v21  ;;  %v493_v2 = vmax.f32 %v461_v53, 0.0 }
  0xd2   : > { %v1214_v38 = vsel %vm1162_vm6, %v1209_v42, %v1213_v59  ;;  %v794_v24 = vshrl.u32 %v693_v61, 16  ;;  %v2202_v4 = vshll.u32 %v4854_v63, 16  ;;  %v2206_v5 = vshrl.u32 %v4854_v63, 16  ;;  %v4870_v58 = vld [vmem:[#allocation2 + $0x4] ss:$8 sps:$4 sm:$0xff]  }
  0xd3   : > { %4324 = vmatmul.mubr.bf16.gmra.mrb[8].mxu1 %v1214_v38  ;;  %v835_v7 = vsel %vm5494_vm4, 0, %v785_v0  ;;  %v836_v37 = vsel %vm5494_vm4, 0, %v792_v1  ;;  %v797_v11 = vshll.u32 %v693_v61, 16  ;;  %v801_v18 = vshrl.u32 %v694_v45, 16 }
  0xd4   : > { %v851_v8 = vsel %vm5500_vm5, %v835_v7, 0  ;;  %v852_v25 = vsel %vm5500_vm5, %v836_v37, 0  ;;  %v796_v9 = vrot.slane %v794_v24, 7  ;;  %v2204_v12 = vrot.slane %v2202_v4, 1  ;;  %v4867_v24 = vld [vmem:[#allocation3 + $0x4] ss:$8 sps:$4 sm:$0xff]  }
  0xd5   : > { %v3945_v15 = vcombine.low %v851_v8, %v852_v25  ;;  %v3946_v17 = vcombine.high %v851_v8, %v852_v25  ;;  %v804_v16 = vshll.u32 %v694_v45, 16  ;;  %v494_v52 = vmax.f32 %v462_v23, 0.0 }
  0xd6   : > { %v799_v22 = vor.u32 %v797_v11, %v796_v9  ;;  %v511_v6 = vpack.c.bf16 %v493_v2, %v493_v2  ;;  %v2205_v10 = vsel %vm1162_vm6, %v2200_v60, %v2204_v12  ;;  %v803_v3 = vrot.slane %v801_v18, 7 }
  0xd7   : > { %1048 = vst [vmem:[#allocation3 + $0x70] sm:$0xff] %v3945_v15  ;;  %1049 = vst [vmem:[#allocation3 + $0x78] sm:$0xff] %v3946_v17  ;;  %4451 = vmatprep.mubr.bf16.mxu0 %v2205_v10  ;;  %v2208_v28 = vor.u32 %v2206_v5, %v2204_v12  ;;  %v512_v29 = vpack.c.bf16 %v494_v52, %v494_v52  ;;  %v1215_v42 = vshrl.u32 %v5735_v41, 16  ;;  %v2463_v23 = vshll.u32 %v4870_v58, 16  ;;  %v4873_v15 = vld [vmem:[#allocation2 + $0x24] ss:$8 sps:$4 sm:$0xff]  }
  0xd8   : > { %v4856_v27 = vld [vmem:[#allocation2 + $0x60] ss:$8 sps:$4 sm:$0xff]   ;;  %v806_v30 = vor.u32 %v804_v16, %v803_v3  ;;  %v837_v31 = vsel %vm5494_vm4, 0, %v799_v22  ;;  %v612_v32 = vshrl.u32 %v511_v6, 16  ;;  %v615_v33 = vshll.u32 %v511_v6, 16 }
  0xd9   : > { %v2210_v34 = vshll.u32 %v4856_v27, 16  ;;  %v853_v26 = vsel %vm5500_vm5, %v837_v31, 0  ;;  %v619_v51 = vshrl.u32 %v512_v29, 16  ;;  %v622_v35 = vshll.u32 %v512_v29, 16  ;;  %v4879_v22 = vld [vmem:[#allocation2 + $0x34] ss:$8 sps:$4 sm:$0xff]  }
  0xda   : > { %v838_v36 = vsel %vm5494_vm4, 0, %v806_v30  ;;  %v614_v39 = vrot.slane %v612_v32, 7  ;;  %v1217_v53 = vor.u32 %v1215_v42, %v1213_v59  ;;  %v4864_v59 = vld [vmem:[#allocation2 + $0x80] ss:$0 sps:$4 sm:$0x11]   ;;  %v2214_v2 = vshrl.u32 %v4856_v27, 16 }
  0xdb   : > { %v2212_v40 = vrot.slane %v2210_v34, 1  ;;  %v854_v20 = vsel %vm5500_vm5, %v838_v36, 0  ;;  %v621_v43 = vrot.slane %v619_v51, 7  ;;  %v2226_v19 = vshll.u32 %v4864_v59, 16  ;;  %v4868_v6 = vld [vmem:[#allocation3 + $0x14] ss:$8 sps:$4 sm:$0xff]  }
  0xdc   : > { %v3947_v44 = vcombine.low %v853_v26, %v854_v20  ;;  %v617_v46 = vor.u32 %v615_v33, %v614_v39  ;;  %v3948_v48 = vcombine.high %v853_v26, %v854_v20  ;;  %v2461_v5 = vshrl.u32 %v4870_v58, 16  ;;  %v4876_v10 = vld [vmem:[#allocation3 + $0x24] ss:$8 sps:$4 sm:$0xff]   ;;  %v4877_v42 = vld [vmem:[#allocation3 + $0x34] ss:$8 sps:$4 sm:$0xff]  }
  0xdd   : > { %v2213_v47 = vsel %vm1162_vm6, %v2208_v28, %v2212_v40  ;;  %v624_v62 = vor.u32 %v622_v35, %v621_v43  ;;  %v2465_v7 = vrot.slane %v2463_v23, 1  ;;  %v2468_v37 = vshll.u32 %v4871_v14, 16  ;;  %v4874_v33 = vld [vmem:[#allocation7 + $0x88] sm:$0xff]   ;;  %v4881_v26 = vld [vmem:[#allocation2 + $0x44] ss:$8 sps:$4 sm:$0xff]   ;;  %v4886_v59 = vld [vmem:[#allocation7 + $0xa0] sm:$0xff]  }
  0xde   : > { %v4859_v49 = vld [vmem:[#allocation3 + $0x70] ss:$8 sps:$4 sm:$0xff]   ;;  %4452 = vmatmul.mubr.bf16.gmra.mrb[8].mxu0 %v2213_v47  ;;  %1050 = vst [vmem:[#allocation3 + $0x80] sm:$0xff] %v3947_v44  ;;  %v658_v50 = vsel %vm5494_vm4, 0, %v617_v46  ;;  %1051 = vst [vmem:[#allocation3 + $0x88] sm:$0xff] %v3948_v48  ;;  %v2216_v9 = vor.u32 %v2214_v2, %v2212_v40  ;;  %v2228_v52 = vrot.slane %v2226_v19, 1 }
  0xdf   : > { %v1219_v55 = vshll.u32 %v4859_v49, 16  ;;  %v659_v41 = vsel %vm5494_vm4, 0, %v624_v62  ;;  %v677_v56 = vsel %vm5500_vm5, %v658_v50, 0  ;;  %v1223_v0 = vshrl.u32 %v4859_v49, 16  ;;  %v5780_v51 = vld [vmem:[#allocation2 + $0x54] ss:$8 sps:$4 sm:$0xff]  }
  0xe0   : > { %v678_v57 = vsel %vm5500_vm5, %v659_v41, 0  ;;  %v2466_v17 = vor.u32 %v2465_v7, %v2461_v5  ;;  %v2470_v18 = vrot.slane %v2468_v37, 1  ;;  %v2472_v28 = vshrl.u32 %v4871_v14, 16  ;;  %v4878_v39 = vld [vmem:[#allocation7 + $0x90] sm:$0xff]   ;;  %v4875_v44 = vld [vmem:[#allocation7 + $0x188] sm:$0xff]  }
  0xe1   : > { %v1221_v21 = vrot.slane %v1219_v55, 1  ;;  %v3931_v61 = vcombine.low %v677_v56, %v678_v57  ;;  %v3932_v63 = vcombine.high %v677_v56, %v678_v57  ;;  %v2476_v29 = vshll.u32 %v4873_v15, 16  ;;  %v5783_v43 = vld [vmem:[#allocation2 + $0x64] ss:$8 sps:$4 sm:$0xff]  }
  0xe2   : > { %v2471_v30 = vsel %vm1162_vm6, %v2466_v17, %v2470_v18  ;;  %v2484_v31 = vshll.u32 %v4879_v22, 16  ;;  %v2480_v34 = vshrl.u32 %v4873_v15, 16  ;;  %v2474_v35 = vor.u32 %v2472_v28, %v2470_v18  ;;  %v4884_v48 = vld [vmem:[#allocation3 + $0x44] ss:$8 sps:$4 sm:$0xff]   ;;  %v4882_v56 = vld [vmem:[#allocation7 + $0x98] sm:$0xff]  }
  0xe3   : > { %v1222_v60 = vsel %vm1162_vm6, %v1217_v53, %v1221_v21  ;;  %949 = vst [vmem:[#allocation2 + $0x70] sm:$0xff] %v3931_v61  ;;  %950 = vst [vmem:[#allocation2 + $0x78] sm:$0xff] %v3932_v63  ;;  %v1225_v38 = vor.u32 %v1223_v0, %v1221_v21  ;;  %v2478_v36 = vrot.slane %v2476_v29, 1  ;;  %v2492_v46 = vshll.u32 %v4881_v26, 16  ;;  %v4900_v53 = vld [vmem:[#allocation3 + $0x4] ss:$8 sps:$4 sm:$0xff]  }
  0xe4   : > { %4327 = vmatprep.mubr.bf16.mxu1 %v1222_v60  ;;  %v2486_v40 = vrot.slane %v2484_v31, 1  ;;  %v2488_v49 = vshrl.u32 %v4879_v22, 16  ;;  %v2500_v62 = vshll.u32 %v5780_v51, 16  ;;  %v2496_v50 = vshrl.u32 %v4881_v26, 16  ;;  %v4880_v55 = vld [vmem:[#allocation7 + $0x190] sm:$0xff]  }
  0xe5   : > { %v4860_v1 = vld [vmem:[#allocation3 + $0x80] ss:$0 sps:$4 sm:$0x11]   ;;  %v2482_v20 = vor.u32 %v2480_v34, %v2478_v36  ;;  %v2479_v47 = vsel %vm1162_vm6, %v2474_v35, %v2478_v36  ;;  %v2494_v41 = vrot.slane %v2492_v46, 1  ;;  %v2508_v21 = vshll.u32 %v5783_v43, 16  ;;  %v4894_v15 = vld [vmem:[#allocation7 + $0xb0] sm:$0xff]  }
  0xe6   : > { %v1227_v45 = vshll.u32 %v4860_v1, 16  ;;  %v2490_v57 = vor.u32 %v2488_v49, %v2486_v40  ;;  %v2502_v58 = vrot.slane %v2500_v62, 1  ;;  %v5792_v63 = vld [vmem:[#allocation3 + $0x14] ss:$8 sps:$4 sm:$0xff]   ;;  %v1641_v14 = vshll.u32 %v4900_v53, 16  ;;  %v4896_v26 = vld [vmem:[#allocation7 + $0x1b0] sm:$0xff]  }
  0xe7   : > { %v4885_v60 = vld [vmem:[#allocation3 + $0x54] ss:$8 sps:$4 sm:$0xff]   ;;  %v2498_v0 = vor.u32 %v2496_v50, %v2494_v41  ;;  %v2504_v1 = vshrl.u32 %v5780_v51, 16  ;;  %v4892_v23 = vld [vmem:[#allocation3 + $0x64] ss:$8 sps:$4 sm:$0xff]   ;;  %v2510_v19 = vrot.slane %v2508_v21, 1 }
  0xe8   : > { %v1229_v4 = vrot.slane %v1227_v45, 1  ;;  %v2512_v5 = vshrl.u32 %v5783_v43, 16  ;;  %v1639_v7 = vshrl.u32 %v4900_v53, 16  ;;  %v4902_v37 = vld [vmem:[#allocation3 + $0x24] ss:$8 sps:$4 sm:$0xff]   ;;  %v1650_v31 = vshrl.u32 %v5792_v63, 16 }
  0xe9   : > { %v2503_v2 = vsel %vm1162_vm6, %v2498_v0, %v2502_v58  ;;  %v4893_v18 = vld [vmem:[#allocation3 + $0x74] ss:$8 sps:$4 sm:$0xff]   ;;  %v1654_v28 = vshll.u32 %v4902_v37, 16  ;;  %v4907_v50 = vld [vmem:[#allocation7 + $0xc8] sm:$0xff]  }
  0xea   : > { %v4862_v8 = vld [vmem:[#allocation2 + $0x70] ss:$8 sps:$4 sm:$0xff]   ;;  %v1230_v25 = vsel %vm1162_vm6, %v1225_v38, %v1229_v4  ;;  %v5790_v61 = vld [vmem:[#allocation2 + $0x74] ss:$8 sps:$4 sm:$0xff]   ;;  %v4883_v38 = vld [vmem:[#allocation7 + $0x198] sm:$0xff]   ;;  %v2514_v22 = vor.u32 %v2512_v5, %v2510_v19 }
  0xeb   : > { %4328 = vmatmul.mubr.bf16.gmra.mrb[12].mxu1 %v1230_v25  ;;  %v2218_v11 = vshll.u32 %v4862_v8, 16  ;;  %v2222_v12 = vshrl.u32 %v4862_v8, 16  ;;  %v2516_v45 = vshll.u32 %v5790_v61, 16  ;;  %v4890_v4 = vld [vmem:[#allocation7 + $0xa8] sm:$0xff]   ;;  %v4888_v8 = vld [vmem:[#allocation7 + $0x1a0] sm:$0xff]   ;;  %v1643_v25 = vrot.slane %v1641_v14, 1 }
  0xec   : > { %4347 = vmatprep.mubr.bf16.mxu1 %v4867_v24  ;;  %v4897_v24 = vld [vmem:[#allocation2 + $0x84] ss:$0 sps:$4 sm:$0x11]   ;;  %v1656_v36 = vrot.slane %v1654_v28, 1  ;;  %v4904_v49 = vld [vmem:[#allocation3 + $0x14] ss:$8 sps:$4 sm:$0xff]  }
  0xed   : > { %v2220_v16 = vrot.slane %v2218_v11, 1  ;;  %v2506_v11 = vor.u32 %v2504_v1, %v2502_v58  ;;  %v2518_v17 = vrot.slane %v2516_v45, 1  ;;  %v4918_v21 = vld [vmem:[#allocation3 + $0x64] ss:$8 sps:$4 sm:$0xff]   ;;  %v4925_v14 = vld [vmem:[#allocation3 + $0x74] ss:$8 sps:$4 sm:$0xff]  }
  0xee   : > { %v1686_v1 = vshll.u32 %v4918_v21, 16  ;;  %v4913_v5 = vld [vmem:[#allocation7 + $0x1d0] sm:$0xff]  }
  0xef   : > { %v2221_v3 = vsel %vm1162_vm6, %v2216_v9, %v2220_v16  ;;  %v2224_v27 = vor.u32 %v2222_v12, %v2220_v16  ;;  %v1646_v9 = vshll.u32 %v5792_v63, 16  ;;  %v5800_v12 = vld [vmem:[#allocation3 + $0x34] ss:$8 sps:$4 sm:$0xff]   ;;  %v4891_v16 = vld [vmem:[#allocation7 + $0x1a8] sm:$0xff]   ;;  %v2519_v29 = vsel %vm1162_vm6, %v2514_v22, %v2518_v17 }
  0xf0   : > { %4455 = vmatprep.mubr.bf16.mxu0 %v2221_v3  ;;  %v2511_v3 = vsel %vm1162_vm6, %v2506_v11, %v2510_v19  ;;  %v1666_v62 = vshrl.u32 %v5800_v12, 16  ;;  %v4912_v63 = vld [vmem:[#allocation3 + $0x34] ss:$8 sps:$4 sm:$0xff]   ;;  %v1690_v19 = vshrl.u32 %v4918_v21, 16  ;;  %v4936_v28 = vld [vmem:[#allocation3 + $0x20] ss:$8 sps:$4 sm:$0xff]  }
  0xf1   : > { %v2229_v32 = vsel %vm1162_vm6, %v2224_v27, %v2228_v52  ;;  %v2524_v52 = vshll.u32 %v4897_v24, 16  ;;  %v2520_v27 = vshrl.u32 %v5790_v61, 16  ;;  %v4926_v24 = vld [vmem:[#allocation3 + $0x84] ss:$0 sps:$4 sm:$0x11]  }
  0xf2   : > { %4456 = vmatmul.mubr.bf16.gmra.mrb[12].mxu0 %v2229_v32  ;;  %v1658_v32 = vshrl.u32 %v4902_v37, 16  ;;  %v4914_v37 = vld [vmem:[#allocation3 + $0x44] ss:$8 sps:$4 sm:$0xff]  }
  0xf3   : > { %4348 = vmatmul.mubr.bf16.vlgmr.msra.gmra.mrb[0].mxu1 %v4868_v6  ;;  %4475 = vmatprep.mubr.bf16.mxu0 %v2471_v30  ;;  %v1644_v6 = vor.u32 %v1643_v25, %v1639_v7  ;;  %v4898_v30 = vld [vmem:[#allocation7 + $0xb8] sm:$0xff]   ;;  %v2522_v51 = vor.u32 %v2520_v27, %v2518_v17  ;;  %v2526_v35 = vrot.slane %v2524_v52, 1  ;;  %v1688_v7 = vrot.slane %v1686_v1, 1  ;;  %v4919_v25 = vld [vmem:[#allocation7 + $0xe0] sm:$0xff]   ;;  %v4923_v52 = vld [vmem:[#allocation7 + $0xe8] sm:$0xff]  }
  0xf4   : > { %4364 = vmatpush3.bf16.msra.mxu1 %v5647_v54  ;;  %4351 = vmatprep.mubr.bf16.mxu1 %v4876_v10  ;;  %v2487_v54 = vsel %vm1162_vm6, %v2482_v20, %v2486_v40  ;;  %v1648_v10 = vrot.slane %v1646_v9, 1  ;;  %v1660_v43 = vor.u32 %v1658_v32, %v1656_v36  ;;  %v1702_v17 = vshll.u32 %v4926_v24, 16  ;;  %v4927_v27 = vld [vmem:[#allocation7 + $0xf0] sm:$0xff]   ;;  %v4928_v32 = vld [vmem:[#allocation3 + $0x74] ss:$8 sps:$4 sm:$0xff]  }
  0xf5   : > { %4365 = vmatprep.subr.bf16.mxu1 %v4874_v33  ;;  %v2527_v46 = vsel %vm1162_vm6, %v2522_v51, %v2526_v35  ;;  %v1692_v9 = vor.u32 %v1690_v19, %v1688_v7  ;;  %v2992_v35 = vshll.u32 %v4936_v28, 16  ;;  %v4946_v19 = vld [vmem:[#allocation2 + $0x44] ss:$8 sps:$4 sm:$0xff]  }
  0xf6   : > { %v1649_v34 = vsel %vm1162_vm6, %v1644_v6, %v1648_v10  ;;  %v1652_v40 = vor.u32 %v1650_v31, %v1648_v10  ;;  %v4921_v10 = vld [vmem:[#allocation7 + $0x1e0] sm:$0xff]   ;;  %v4922_v31 = vld [vmem:[#allocation3 + $0x64] ss:$8 sps:$4 sm:$0xff]  }
  0xf8   : > { %4366 = vmatpush3.bf16.msra.mxu1 %v4874_v33  ;;  %v1662_v33 = vshll.u32 %v5800_v12, 16  ;;  %v4916_v12 = vld [vmem:[#allocation7 + $0x1d8] sm:$0xff]  }
  0xf9   : > { %4367 = vmatprep.subr.bf16.mxu1 %v4878_v39 }
  0xfa   : > { %4476 = vmatmul.mubr.bf16.vlgmr.msra.gmra.mrb[0].mxu0 %v2479_v47  ;;  %v1664_v20 = vrot.slane %v1662_v33, 1  ;;  %v4899_v47 = vld [vmem:[#allocation7 + $0x1b8] sm:$0xff]   ;;  %v4924_v33 = vld [vmem:[#allocation7 + $0x1e8] sm:$0xff]  }
  0xfb   : > { %4492 = vmatpush3.bf16.msra.mxu0 %v5712_v13  ;;  %4352 = vmatmul.mubr.bf16.gmra.mrb[4].mxu1 %v4877_v42  ;;  %v2495_v13 = vsel %vm1162_vm6, %v2490_v57, %v2494_v41  ;;  %v4903_v42 = vld [vmem:[#allocation7 + $0xc0] sm:$0xff]   ;;  %v4906_v57 = vld [vmem:[#allocation3 + $0x24] ss:$8 sps:$4 sm:$0xff]  }
  0xfc   : > { %4493 = vmatprep.subr.bf16.mxu0 %v4875_v44  ;;  %4479 = vmatprep.mubr.bf16.mxu0 %v2487_v54  ;;  %v1657_v54 = vsel %vm1162_vm6, %v1652_v40, %v1656_v36  ;;  %v1665_v53 = vsel %vm1162_vm6, %v1660_v43, %v1664_v20  ;;  %v1668_v61 = vor.u32 %v1666_v62, %v1664_v20  ;;  %v4938_v40 = vld [vmem:[#allocation3 + $0x30] ss:$8 sps:$4 sm:$0xff]   ;;  %v4929_v20 = vld [vmem:[#allocation7 + $0x1f0] sm:$0xff]  }
  0xfd   : > { %4368 = vmatpush3.bf16.msra.mxu1 %v4878_v39  ;;  %4355 = vmatprep.mubr.bf16.mxu1 %v4884_v48  ;;  %v4910_v39 = vld [vmem:[#allocation3 + $0x44] ss:$8 sps:$4 sm:$0xff]  }
  0xfe   : > { %4369 = vmatprep.subr.bf16.mxu1 %v4882_v56  ;;  %v1670_v48 = vshll.u32 %v4910_v39, 16 }
  0xff   : > { %4494 = vmatpush3.bf16.msra.mxu0 %v4875_v44  ;;  %v4917_v44 = vld [vmem:[#allocation3 + $0x54] ss:$8 sps:$4 sm:$0xff]  }
 0x100   : > { %4495 = vmatprep.subr.bf16.mxu0 %v4880_v55  ;;  %v1678_v41 = vshll.u32 %v4917_v44, 16  ;;  %v1672_v58 = vrot.slane %v1670_v48, 1  ;;  %v1682_v45 = vshrl.u32 %v4917_v44, 16  ;;  %v2994_v44 = vrot.slane %v2992_v35, 1  ;;  %v4961_v48 = vld [vmem:[#allocation9] sm:$0xff]   ;;  %v4973_v35 = vld [vmem:[#allocation9 + $0x30] sm:$0xff]  }
 0x101   : > { %4370 = vmatpush3.bf16.msra.mxu1 %v4882_v56  ;;  %v4905_v56 = vld [vmem:[#allocation7 + $0x1c0] sm:$0xff]  }
 0x102   : > { %4480 = vmatmul.mubr.bf16.gmra.mrb[4].mxu0 %v2495_v13  ;;  %4371 = vmatprep.subr.bf16.mxu1 %v4886_v59  ;;  %v4908_v13 = vld [vmem:[#allocation7 + $0x1c8] sm:$0xff]  }
 0x103   : > { %4496 = vmatpush3.bf16.msra.mxu0 %v4880_v55  ;;  %4356 = vmatmul.mubr.bf16.gmra.mrb[8].mxu1 %v4885_v60  ;;  %v1674_v55 = vshrl.u32 %v4910_v39, 16  ;;  %v4911_v60 = vld [vmem:[#allocation7 + $0xd0] sm:$0xff]  }
 0x104   : > { %4497 = vmatprep.subr.bf16.mxu0 %v4883_v38  ;;  %4483 = vmatprep.mubr.bf16.mxu0 %v2503_v2  ;;  %v4933_v39 = vld [vmem:[#allocation2 + $0x4] ss:$8 sps:$4 sm:$0xff]  }
 0x105   : > { %4372 = vmatpush3.bf16.msra.mxu1 %v4886_v59  ;;  %4359 = vmatprep.mubr.bf16.mxu1 %v4892_v23  ;;  %v1676_v0 = vor.u32 %v1674_v55, %v1672_v58  ;;  %v1680_v59 = vrot.slane %v1678_v41, 1  ;;  %v1673_v23 = vsel %vm1162_vm6, %v1668_v61, %v1672_v58  ;;  %v3004_v55 = vshrl.u32 %v4938_v40, 16  ;;  %v4940_v41 = vld [vmem:[#allocation2 + $0x24] ss:$8 sps:$4 sm:$0xff]   ;;  %v4962_v58 = vld [vmem:[#allocation9 + $0x8] sm:$0xff]   ;;  %v4937_v61 = vld [vmem:[#allocation7 + $0x200] sm:$0xff]  }
 0x106   : > { %4373 = vmatprep.subr.bf16.mxu1 %v4890_v4 }
 0x107   : > { %4498 = vmatpush3.bf16.msra.mxu0 %v4883_v38  ;;  %v4915_v38 = vld [vmem:[#allocation7 + $0xd8] sm:$0xff]   ;;  %v1681_v2 = vsel %vm1162_vm6, %v1676_v0, %v1680_v59  ;;  %v4948_v0 = vld [vmem:[#allocation3 + $0x60] ss:$8 sps:$4 sm:$0xff]  }
 0x108   : > { %4499 = vmatprep.subr.bf16.mxu0 %v4888_v8 }
 0x109   : > { %4374 = vmatpush3.bf16.msra.mxu1 %v4890_v4  ;;  %v1694_v4 = vshll.u32 %v4925_v14, 16 }
 0x10a   : > { %4484 = vmatmul.mubr.bf16.gmra.mrb[8].mxu0 %v2511_v3  ;;  %4375 = vmatprep.subr.bf16.mxu1 %v4894_v15  ;;  %v1704_v3 = vrot.slane %v1702_v17, 1 }
 0x10b   : > { %4500 = vmatpush3.bf16.msra.mxu0 %v4888_v8  ;;  %4360 = vmatmul.mubr.bf16.gmra.mrb[12].mxu1 %v4893_v18  ;;  %v1684_v8 = vor.u32 %v1682_v45, %v1680_v59  ;;  %v1696_v11 = vrot.slane %v1694_v4, 1  ;;  %v4935_v18 = vld [vmem:[#allocation3 + $0x10] ss:$8 sps:$4 sm:$0xff]  }
 0x10c   : > { %4501 = vmatprep.subr.bf16.mxu0 %v4891_v16  ;;  %4487 = vmatprep.mubr.bf16.mxu0 %v2519_v29  ;;  %v2987_v29 = vshll.u32 %v4935_v18, 16 }
 0x10d   : > { %4376 = vmatpush3.bf16.msra.mxu1 %v4894_v15  ;;  %4379 = vmatprep.mubr.bf16.mxu1 %v1649_v34  ;;  %v4920_v15 = vld [vmem:[#allocation3 + $0x54] ss:$8 sps:$4 sm:$0xff]   ;;  %v1689_v22 = vsel %vm1162_vm6, %v1684_v8, %v1688_v7  ;;  %v1697_v6 = vsel %vm1162_vm6, %v1692_v9, %v1696_v11  ;;  %v2985_v34 = vshrl.u32 %v4935_v18, 16  ;;  %v4943_v8 = vld [vmem:[#allocation7 + $0x210] sm:$0xff]  }
 0x10e   : > { %4377 = vmatprep.subr.bf16.mxu1 %v4898_v30  ;;  %v2989_v51 = vrot.slane %v2987_v29, 1  ;;  %v4966_v7 = vld [vmem:[#allocation9 + $0x18] sm:$0xff]   ;;  %v4970_v29 = vld [vmem:[#allocation9 + $0x28] sm:$0xff]  }
 0x10f   : > { %4502 = vmatpush3.bf16.msra.mxu0 %v4891_v16  ;;  %v1698_v16 = vshrl.u32 %v4925_v14, 16  ;;  %v4965_v14 = vld [vmem:[#allocation9 + $0x10] sm:$0xff]   ;;  %v4945_v18 = vld [vmem:[#allocation7 + $0x218] sm:$0xff]  }
 0x110   : > { %4503 = vmatprep.subr.bf16.mxu0 %v4896_v26  ;;  %v2990_v43 = vor.u32 %v2989_v51, %v2985_v34 }
 0x111   : > { %4378 = vmatpush3.bf16.msra.mxu1 %v4898_v30  ;;  %v1700_v30 = vor.u32 %v1698_v16, %v1696_v11  ;;  %v4954_v11 = vld [vmem:[#allocation3 + $0x80] ss:$8 sps:$4 sm:$0xff]   ;;  %v4947_v16 = vld [vmem:[#allocation2 + $0x54] ss:$8 sps:$4 sm:$0xff]  }
 0x112   : > { %4488 = vmatmul.mubr.bf16.gmra.mrb[12].mxu0 %v2527_v46  ;;  %4395 = vmatprep.subr.bf16.mxu1 %v4903_v42  ;;  %v4930_v46 = vld [vmem:[#allocation3 + $0x84] ss:$8 sps:$4 sm:$0xff]  }
 0x113   : > { %4504 = vmatpush3.bf16.msra.mxu0 %v4896_v26  ;;  %4507 = vmatprep.mubr.bf16.mxu0 %v4904_v49  ;;  %v4931_v26 = vld [vmem:[#allocation7 + $0xf8] sm:$0xff]   ;;  %v1705_v36 = vsel %vm1162_vm6, %v1700_v30, %v1704_v3  ;;  %v3000_v49 = vshll.u32 %v4938_v40, 16 }
 0x114   : > { %4505 = vmatprep.subr.bf16.mxu0 %v4899_v47  ;;  %4380 = vmatmul.mubr.bf16.vlgmr.msra.gmra.mrb[0].mxu1 %v1657_v54  ;;  %v4932_v54 = vld [vmem:[#allocation7 + $0x1f8] sm:$0xff]  }
 0x115   : > { %4396 = vmatpush3.bf16.msra.mxu1 %v4903_v42  ;;  %4383 = vmatprep.mubr.bf16.mxu1 %v1665_v53  ;;  %v4942_v42 = vld [vmem:[#allocation3 + $0x40] ss:$8 sps:$4 sm:$0xff]   ;;  %v2995_v53 = vsel %vm1162_vm6, %v2990_v43, %v2994_v44  ;;  %v4958_v3 = vld [vmem:[#allocation3 + $0x14] ss:$8 sps:$4 sm:$0xff]  }
 0x116   : > { %4397 = vmatprep.subr.bf16.mxu1 %v4907_v50  ;;  %v3008_v62 = vshll.u32 %v4942_v42, 16  ;;  %v3012_v1 = vshrl.u32 %v4942_v42, 16  ;;  %v3285_v51 = vshll.u32 %v4958_v3, 16  ;;  %v4951_v42 = vld [vmem:[#allocation7 + $0x228] sm:$0xff]  }
 0x117   : > { %4506 = vmatpush3.bf16.msra.mxu0 %v4899_v47  ;;  %v2996_v47 = vshrl.u32 %v4936_v28, 16 }
 0x118   : > { %4523 = vmatprep.subr.bf16.mxu0 %v4905_v56 }
 0x119   : > { %4398 = vmatpush3.bf16.msra.mxu1 %v4907_v50  ;;  %v4934_v50 = vld [vmem:[#allocation2 + $0x14] ss:$8 sps:$4 sm:$0xff]   ;;  %v2998_v21 = vor.u32 %v2996_v47, %v2994_v44  ;;  %v3283_v44 = vshrl.u32 %v4958_v3, 16 }
 0x11a   : > { %4508 = vmatmul.mubr.bf16.vlgmr.msra.gmra.mrb[0].mxu0 %v4906_v57  ;;  %4399 = vmatprep.subr.bf16.mxu1 %v4911_v60  ;;  %v4944_v57 = vld [vmem:[#allocation3 + $0x50] ss:$8 sps:$4 sm:$0xff]  }
 0x11b   : > { %4524 = vmatpush3.bf16.msra.mxu0 %v4905_v56  ;;  %4511 = vmatprep.mubr.bf16.mxu0 %v4912_v63  ;;  %v3002_v56 = vrot.slane %v3000_v49, 1  ;;  %v3010_v63 = vrot.slane %v3008_v62, 1  ;;  %v3016_v59 = vshll.u32 %v4944_v57, 16  ;;  %v3020_v24 = vshrl.u32 %v4944_v57, 16  ;;  %v4975_v49 = vld [vmem:[%s5434_s14] sm:$0xff] }
 0x11c   : > { %4525 = vmatprep.subr.bf16.mxu0 %v4908_v13  ;;  %4384 = vmatmul.mubr.bf16.gmra.mrb[4].mxu1 %v1673_v23  ;;  %v4939_v23 = vld [vmem:[#allocation7 + $0x208] sm:$0xff]   ;;  %v4976_v62 = vld [vmem:[%s5434_s14 + $0x20] sm:$0xff] }
 0x11d   : > { %4400 = vmatpush3.bf16.msra.mxu1 %v4911_v60  ;;  %4387 = vmatprep.mubr.bf16.mxu1 %v1681_v2  ;;  %v3006_v60 = vor.u32 %v3004_v55, %v3002_v56  ;;  %v3024_v2 = vshll.u32 %v4948_v0, 16  ;;  %v3018_v4 = vrot.slane %v3016_v59, 1 }
 0x11e   : > { %4401 = vmatprep.subr.bf16.mxu1 %v4915_v38 }
 0x11f   : > { %4526 = vmatpush3.bf16.msra.mxu0 %v4908_v13  ;;  %v3003_v13 = vsel %vm1162_vm6, %v2998_v21, %v3002_v56  ;;  %v3011_v45 = vsel %vm1162_vm6, %v3006_v60, %v3010_v63  ;;  %v3026_v9 = vrot.slane %v3024_v2, 1  ;;  %v4957_v60 = vld [vmem:[#allocation7 + $0x238] sm:$0xff]  }
 0x120   : > { %4527 = vmatprep.subr.bf16.mxu0 %v4913_v5 }
 0x121   : > { %4402 = vmatpush3.bf16.msra.mxu1 %v4915_v38  ;;  %v4941_v38 = vld [vmem:[#allocation2 + $0x34] ss:$8 sps:$4 sm:$0xff]  }
 0x122   : > { %4512 = vmatmul.mubr.bf16.gmra.mrb[4].mxu0 %v4914_v37  ;;  %4403 = vmatprep.subr.bf16.mxu1 %v4919_v25  ;;  %v3014_v37 = vor.u32 %v3012_v1, %v3010_v63  ;;  %v4978_v1 = vld [vmem:[%s5434_s14 + $0x60] sm:$0xff] }
 0x123   : > { %4528 = vmatpush3.bf16.msra.mxu0 %v4913_v5  ;;  %4515 = vmatprep.mubr.bf16.mxu0 %v4920_v15  ;;  %v4950_v5 = vld [vmem:[#allocation3 + $0x70] ss:$8 sps:$4 sm:$0xff]  }
 0x124   : > { %4529 = vmatprep.subr.bf16.mxu0 %v4916_v12  ;;  %4388 = vmatmul.mubr.bf16.gmra.mrb[8].mxu1 %v1689_v22  ;;  %v4969_v15 = vld [vmem:[#allocation9 + $0x20] sm:$0xff]   ;;  %v3019_v17 = vsel %vm1162_vm6, %v3014_v37, %v3018_v4  ;;  %v3028_v22 = vshrl.u32 %v4948_v0, 16  ;;  %v4967_v37 = vld [vmem:[#allocation3 + $0x64] ss:$8 sps:$4 sm:$0xff]  }
 0x125   : > { %4404 = vmatpush3.bf16.msra.mxu1 %v4919_v25  ;;  %4391 = vmatprep.mubr.bf16.mxu1 %v1697_v6  ;;  %v3022_v25 = vor.u32 %v3020_v24, %v3018_v4  ;;  %v3036_v6 = vshrl.u32 %v4950_v5, 16 }
 0x126   : > { %4405 = vmatprep.subr.bf16.mxu1 %v4923_v52  ;;  %v3030_v30 = vor.u32 %v3028_v22, %v3026_v9 }
 0x127   : > { %4530 = vmatpush3.bf16.msra.mxu0 %v4916_v12  ;;  %v3032_v12 = vshll.u32 %v4950_v5, 16 }
 0x128   : > { %4531 = vmatprep.subr.bf16.mxu0 %v4921_v10 }
 0x129   : > { %4406 = vmatpush3.bf16.msra.mxu1 %v4923_v52  ;;  %v3027_v52 = vsel %vm1162_vm6, %v3022_v25, %v3026_v9  ;;  %v3034_v28 = vrot.slane %v3032_v12, 1 }
 0x12a   : > { %4516 = vmatmul.mubr.bf16.gmra.mrb[8].mxu0 %v4922_v31  ;;  %4407 = vmatprep.subr.bf16.mxu1 %v4927_v27  ;;  %v4956_v31 = vld [vmem:[#allocation3 + $0x90] ss:$0 sps:$4 sm:$0x11]  }
 0x12b   : > { %4532 = vmatpush3.bf16.msra.mxu0 %v4921_v10  ;;  %4519 = vmatprep.mubr.bf16.mxu0 %v4928_v32  ;;  %v3040_v10 = vshll.u32 %v4954_v11, 16  ;;  %v4949_v32 = vld [vmem:[#allocation7 + $0x220] sm:$0xff]   ;;  %v3048_v40 = vshll.u32 %v4956_v31, 16 }
 0x12c   : > { %4533 = vmatprep.subr.bf16.mxu0 %v4924_v33  ;;  %4392 = vmatmul.mubr.bf16.gmra.mrb[12].mxu1 %v1705_v36  ;;  %v3035_v36 = vsel %vm1162_vm6, %v3030_v30, %v3034_v28  ;;  %v3326_v30 = vshrl.u32 %v4967_v37, 16 }
 0x12d   : > { %4408 = vmatpush3.bf16.msra.mxu1 %v4927_v27  ;;  %4411 = vmatprep.mubr.bf16.mxu1 %v4933_v39  ;;  %v4952_v27 = vld [vmem:[#allocation2 + $0x64] ss:$8 sps:$4 sm:$0xff]   ;;  %v3042_v34 = vrot.slane %v3040_v10, 1  ;;  %v3044_v39 = vshrl.u32 %v4954_v11, 16  ;;  %v3050_v55 = vrot.slane %v3048_v40, 1 }
 0x12e   : > { %4409 = vmatprep.subr.bf16.mxu1 %v4931_v26 }
 0x12f   : > { %4534 = vmatpush3.bf16.msra.mxu0 %v4924_v33  ;;  %v3038_v33 = vor.u32 %v3036_v6, %v3034_v28 }
 0x130   : > { %4535 = vmatprep.subr.bf16.mxu0 %v4929_v20 }
 0x131   : > { %4410 = vmatpush3.bf16.msra.mxu1 %v4931_v26  ;;  %v4959_v26 = vld [vmem:[#allocation3 + $0x24] ss:$8 sps:$4 sm:$0xff]   ;;  %v3043_v43 = vsel %vm1162_vm6, %v3038_v33, %v3042_v34 }
 0x132   : > { %4520 = vmatmul.mubr.bf16.gmra.mrb[12].mxu0 %v4930_v46  ;;  %4587 = vmatprep.subr.bf16.mxu1 %v4961_v48  ;;  %v3287_v46 = vrot.slane %v3285_v51, 1  ;;  %v3290_v47 = vshll.u32 %v4959_v26, 16  ;;  %v3294_v63 = vshrl.u32 %v4959_v26, 16  ;;  %v4972_v51 = vld [vmem:[#allocation3 + $0x94] ss:$0 sps:$4 sm:$0x11]  }
 0x133   : > { %4536 = vmatpush3.bf16.msra.mxu0 %v4929_v20  ;;  %4539 = vmatprep.mubr.bf16.mxu0 %v2995_v53  ;;  %v4953_v20 = vld [vmem:[#allocation2 + $0x74] ss:$8 sps:$4 sm:$0xff]   ;;  %v3046_v53 = vor.u32 %v3044_v39, %v3042_v34 }
 0x134   : > { %4537 = vmatprep.subr.bf16.mxu0 %v4932_v54  ;;  %4412 = vmatmul.mubr.bf16.vlgmr.msra.gmra.mrb[0].mxu1 %v4934_v50  ;;  %v4974_v50 = vld [vmem:[#allocation9 + $0x38] sm:$0xff]   ;;  %v3288_v56 = vor.u32 %v3287_v46, %v3283_v44  ;;  %v3292_v57 = vrot.slane %v3290_v47, 1 }
 0x135   : > { %4415 = vmatprep.mubr.bf16.mxu1 %v4940_v41  ;;  %4588 = vmatpush3.bf16.msra.mxu1 %v4961_v48  ;;  %v3555_v48 = vpack.c.bf16 %v4976_v62, %v4975_v49  ;;  %v4955_v41 = vld [vmem:[#allocation7 + $0x230] sm:$0xff]  }
 0x136   : > { %4589 = vmatprep.subr.bf16.mxu1 %v4962_v58  ;;  %v3293_v0 = vsel %vm1162_vm6, %v3288_v56, %v3292_v57  ;;  %v3296_v4 = vor.u32 %v3294_v63, %v3292_v57 }
 0x137   : > { %4538 = vmatpush3.bf16.msra.mxu0 %v4932_v54  ;;  %v4960_v54 = vld [vmem:[#allocation3 + $0x34] ss:$8 sps:$4 sm:$0xff]  }
 0x138   : > { %4555 = vmatprep.subr.bf16.mxu0 %v4937_v61  ;;  %v3298_v21 = vshll.u32 %v4960_v54, 16  ;;  %v3302_v59 = vshrl.u32 %v4960_v54, 16 }
 0x139   : > { %4590 = vmatpush3.bf16.msra.mxu1 %v4962_v58  ;;  %v4963_v58 = vld [vmem:[#allocation3 + $0x44] ss:$8 sps:$4 sm:$0xff]  }
 0x13a   : > { %4540 = vmatmul.mubr.bf16.vlgmr.msra.gmra.mrb[0].mxu0 %v3003_v13  ;;  %4591 = vmatprep.subr.bf16.mxu1 %v4965_v14  ;;  %v4977_v13 = vld [vmem:[%s5434_s14 + $0x40] sm:$0xff]  ;;  %v3300_v2 = vrot.slane %v3298_v21, 1  ;;  %v3310_v9 = vshrl.u32 %v4963_v58, 16 }
 0x13b   : > { %4556 = vmatpush3.bf16.msra.mxu0 %v4937_v61  ;;  %4543 = vmatprep.mubr.bf16.mxu0 %v3011_v45  ;;  %v3051_v61 = vsel %vm1162_vm6, %v3046_v53, %v3050_v55  ;;  %v4980_v45 = vld [vmem:[%s5434_s14 + $0xa0] sm:$0xff] }
 0x13c   : > { %4557 = vmatprep.subr.bf16.mxu0 %v4939_v23  ;;  %4416 = vmatmul.mubr.bf16.gmra.mrb[4].mxu1 %v4941_v38  ;;  %v4979_v38 = vld [vmem:[%s5434_s14 + $0x80] sm:$0xff]  ;;  %v3304_v5 = vor.u32 %v3302_v59, %v3300_v2  ;;  %v3301_v25 = vsel %vm1162_vm6, %v3296_v4, %v3300_v2 }
 0x13d   : > { %4419 = vmatprep.mubr.bf16.mxu1 %v4946_v19  ;;  %4592 = vmatpush3.bf16.msra.mxu1 %v4965_v14  ;;  %v3306_v14 = vshll.u32 %v4963_v58, 16  ;;  %v3557_v24 = vpack.c.bf16 %v4980_v45, %v4979_v38  ;;  %v4964_v19 = vld [vmem:[#allocation3 + $0x54] ss:$8 sps:$4 sm:$0xff]  }
 0x13e   : > { %4593 = vmatprep.subr.bf16.mxu1 %v4966_v7  ;;  %v3318_v12 = vshrl.u32 %v4964_v19, 16 }
 0x13f   : > { %4558 = vmatpush3.bf16.msra.mxu0 %v4939_v23  ;;  %v3556_v23 = vpack.c.bf16 %v4978_v1, %v4977_v13 }
 0x140   : > { %4559 = vmatprep.subr.bf16.mxu0 %v4943_v8 }
 0x141   : > { %4594 = vmatpush3.bf16.msra.mxu1 %v4966_v7  ;;  %v3308_v7 = vrot.slane %v3306_v14, 1 }
 0x142   : > { %4544 = vmatmul.mubr.bf16.gmra.mrb[4].mxu0 %v3019_v17  ;;  %4595 = vmatprep.subr.bf16.mxu1 %v4969_v15  ;;  %v4981_v17 = vld [vmem:[%s5434_s14 + $0xc0] sm:$0xff] }
 0x143   : > { %4560 = vmatpush3.bf16.msra.mxu0 %v4943_v8  ;;  %4547 = vmatprep.mubr.bf16.mxu0 %v3027_v52  ;;  %v3314_v8 = vshll.u32 %v4964_v19, 16  ;;  %v3309_v11 = vsel %vm1162_vm6, %v3304_v5, %v3308_v7  ;;  %v4968_v52 = vld [vmem:[#allocation3 + $0x74] ss:$8 sps:$4 sm:$0xff]   ;;  %v3312_v6 = vor.u32 %v3310_v9, %v3308_v7 }
 0x144   : > { %4561 = vmatprep.subr.bf16.mxu0 %v4945_v18  ;;  %4420 = vmatmul.mubr.bf16.gmra.mrb[8].mxu1 %v4947_v16  ;;  %v3330_v28 = vshll.u32 %v4968_v52, 16 }
 0x145   : > { %4423 = vmatprep.mubr.bf16.mxu1 %v4952_v27  ;;  %4596 = vmatpush3.bf16.msra.mxu1 %v4969_v15  ;;  %v3322_v15 = vshll.u32 %v4967_v37, 16  ;;  %v3316_v16 = vrot.slane %v3314_v8, 1  ;;  %v4971_v27 = vld [vmem:[#allocation3 + $0x84] ss:$8 sps:$4 sm:$0xff]  }
 0x146   : > { %4597 = vmatprep.subr.bf16.mxu1 %v4970_v29  ;;  %v3338_v33 = vshll.u32 %v4971_v27, 16  ;;  %v3332_v34 = vrot.slane %v3330_v28, 1  ;;  %v3342_v40 = vshrl.u32 %v4971_v27, 16 }
 0x147   : > { %4562 = vmatpush3.bf16.msra.mxu0 %v4945_v18  ;;  %v4982_v18 = vld [vmem:[%s5434_s14 + $0xe0] sm:$0xff]  ;;  %v3320_v10 = vor.u32 %v3318_v12, %v3316_v16  ;;  %v3324_v3 = vrot.slane %v3322_v15, 1 }
 0x148   : > { %4563 = vmatprep.subr.bf16.mxu0 %v4949_v32  ;;  %v3558_v22 = vpack.c.bf16 %v4982_v18, %v4981_v17 }
 0x149   : > { %4598 = vmatpush3.bf16.msra.mxu1 %v4970_v29  ;;  %v3317_v29 = vsel %vm1162_vm6, %v3312_v6, %v3316_v16  ;;  %v3325_v31 = vsel %vm1162_vm6, %v3320_v10, %v3324_v3  ;;  %v3328_v26 = vor.u32 %v3326_v30, %v3324_v3 }
 0x14a   : > { %4548 = vmatmul.mubr.bf16.gmra.mrb[8].mxu0 %v3035_v36  ;;  %4599 = vmatprep.subr.bf16.mxu1 %v4973_v35  ;;  %v3340_v36 = vrot.slane %v3338_v33, 1 }
 0x14b   : > { %4564 = vmatpush3.bf16.msra.mxu0 %v4949_v32  ;;  %4551 = vmatprep.mubr.bf16.mxu0 %v3043_v43  ;;  %v3334_v32 = vshrl.u32 %v4968_v52, 16  ;;  %v3333_v39 = vsel %vm1162_vm6, %v3328_v26, %v3332_v34 }
 0x14c   : > { %4565 = vmatprep.subr.bf16.mxu0 %v4951_v42  ;;  %4424 = vmatmul.mubr.bf16.gmra.mrb[12].mxu1 %v4953_v20  ;;  %v3344_v43 = vor.u32 %v3342_v40, %v3340_v36 }
 0x14d   : > { %4600 = vmatpush3.bf16.msra.mxu1 %v4973_v35  ;;  %4603 = vmatprep.mubr.bf16.mxu1 %v3555_v48  ;;  %v3336_v35 = vor.u32 %v3334_v32, %v3332_v34 }
 0x14e   : > { %4601 = vmatprep.subr.bf16.mxu1 %v4974_v50 }
 0x14f   : > { %4566 = vmatpush3.bf16.msra.mxu0 %v4951_v42  ;;  %v3346_v42 = vshll.u32 %v4972_v51, 16  ;;  %v3341_v20 = vsel %vm1162_vm6, %v3336_v35, %v3340_v36 }
 0x150   : > { %4567 = vmatprep.subr.bf16.mxu0 %v4955_v41 }
 0x151   : > { %4602 = vmatpush3.bf16.msra.mxu1 %v4974_v50  ;;  %v3348_v44 = vrot.slane %v3346_v42, 1 }
 0x152   : > { %4552 = vmatmul.mubr.bf16.gmra.mrb[12].mxu0 %v3051_v61 }
 0x153   : > { %4568 = vmatpush3.bf16.msra.mxu0 %v4955_v41  ;;  %4571 = vmatprep.mubr.bf16.mxu0 %v3293_v0  ;;  %v3349_v46 = vsel %vm1162_vm6, %v3344_v43, %v3348_v44 }
 0x154   : > { %4569 = vmatprep.subr.bf16.mxu0 %v4957_v60  ;;  %4604 = vmatmul.mubr.bf16.vlgmr.msra.gmra.mrb[16].mxu1 %v3556_v23 }
 0x155   : > { %4607 = vmatprep.mubr.bf16.mxu1 %v3557_v24 }
 0x157   : > { %4570 = vmatpush3.bf16.msra.mxu0 %v4957_v60 }
 0x15a   : > { %4572 = vmatmul.mubr.bf16.vlgmr.msra.gmra.mrb[0].mxu0 %v3301_v25 }
 0x15b   : > { %4575 = vmatprep.mubr.bf16.mxu0 %v3309_v11 }
 0x15c   : > { %4608 = vmatmul.mubr.bf16.gmra.mrb[20].mxu1 %v3558_v22 }
 0x162   : > { %4576 = vmatmul.mubr.bf16.gmra.mrb[4].mxu0 %v3317_v29 }
 0x163   : > { %4579 = vmatprep.mubr.bf16.mxu0 %v3325_v31 }
 0x16a   : > { %4580 = vmatmul.mubr.bf16.gmra.mrb[8].mxu0 %v3333_v39 }
 0x16b   : > { %4583 = vmatprep.mubr.bf16.mxu0 %v3341_v20 }
 0x172   : > { %4584 = vmatmul.mubr.bf16.gmra.mrb[12].mxu0 %v3349_v46 }
 0x207   : > { %v4413_v47 = vpop.f32.mrb[0].mxu1 }
 0x208   : > { %v2022_v49 = vpop.f32.mrb[1].mxu1 }
 0x209   : > { %v4414_v62 = vpop.f32.mrb[2].mxu1 }
 0x20a   : > { %v2025_v48 = vpop.f32.mrb[3].mxu1 }
 0x20f   : > { %v4417_v54 = vpop.f32.mrb[4].mxu1 }
 0x210   : > { %v2036_v50 = vpop.f32.mrb[5].mxu1 }
 0x211   : > { %v4418_v53 = vpop.f32.mrb[6].mxu1 }
 0x212   : > { %v2039_v55 = vpop.f32.mrb[7].mxu1 }
 0x217   : > { %v4421_v41 = vpop.f32.mrb[8].mxu1 }
 0x218   : > { %v2050_v56 = vpop.f32.mrb[9].mxu1 }
 0x219   : > { %v4422_v57 = vpop.f32.mrb[10].mxu1 }
 0x21a   : > { %v2053_v58 = vpop.f32.mrb[11].mxu1 }
 0x21f   : > { %v5841_v21 = vpop.f32.mrb[12].mxu1 }
 0x220   : > { %v5843_v61 = vpop.f32.mrb[13].mxu1 }
 0x221   : > { %v4426_v63 = vpop.f32.mrb[14].mxu1 }
 0x222   : > { %v2067_v60 = vpop.f32.mrb[15].mxu1 }
 0x227   : > { %v4605_v0 = vpop.f32.mrb[16].mxu1 }
 0x228   : > { %3690 = vst [vmem:[%s5846_s12 + $0x10] sm:$0xff] %v4605_v0  ;;  %v3657_v59 = vpop.f32.mrb[17].mxu1 }
 0x229   : > { %3688 = vst [vmem:[%s5846_s12] sm:$0xff] %v3657_v59  ;;  %v4606_v14 = vpop.f32.mrb[18].mxu1 }
 0x22a   : > { %3691 = vst [vmem:[%s5846_s12 + $0x18] sm:$0xff] %v4606_v14  ;;  %v3660_v13 = vpop.f32.mrb[19].mxu1 }
 0x22b   : > { %3689 = vst [vmem:[%s5846_s12 + $0x8] sm:$0xff] %v3660_v13 }
 0x22d   : > { %v4573_v1 = vpop.f32.mrb[0].mxu0 }
 0x22e   : > { %v4611_v23 = vadd.f32 %v4573_v1, %v4413_v47  ;;  %v3440_v38 = vpop.f32.mrb[1].mxu0 }
 0x22f   : > { %v4612_v45 = vadd.f32 %v3440_v38, %v2022_v49  ;;  %v4574_v24 = vpop.f32.mrb[2].mxu0  ;;  %v4609_v2 = vpop.f32.mrb[20].mxu1 }
 0x230   : > { %v3534_v19 = vmul.f32 %v4611_v23, %v4611_v23  ;;  %v3443_v4 = vpop.f32.mrb[3].mxu0  ;;  %3694 = vst [vmem:[%s5846_s12 + $0x30] sm:$0xff] %v4609_v2  ;;  %v3673_v5 = vpop.f32.mrb[21].mxu1 }
 0x231   : > { %v4123_v7 = vpack.c.bf16 %v4611_v23, %v4612_v45  ;;  %v3519_v37 = vadd.f32 %v4612_v45, %v4611_v23  ;;  %v3533_v8 = vmul.f32 %v4612_v45, %v4612_v45  ;;  %3692 = vst [vmem:[%s5846_s12 + $0x20] sm:$0xff] %v3673_v5  ;;  %v4610_v25 = vpop.f32.mrb[22].mxu1 }
 0x232   : > { %3695 = vst [vmem:[%s5846_s12 + $0x38] sm:$0xff] %v4610_v25  ;;  %v3676_v9 = vpop.f32.mrb[23].mxu1 }
 0x233   : > { %4124 = vst [vmem:[%s5856_s17] sm:$0xff] %v4123_v7   ;;  %v3541_v11 = vadd.f32 %v3534_v19, %v3533_v8  ;;  %3693 = vst [vmem:[%s5846_s12 + $0x28] sm:$0xff] %v3676_v9 }
 0x235   : > { %v4577_v12 = vpop.f32.mrb[4].mxu0 }
 0x236   : > { %v4613_v15 = vadd.f32 %v4577_v12, %v4417_v54  ;;  %v3454_v17 = vpop.f32.mrb[5].mxu0 }
 0x237   : > { %v4614_v18 = vadd.f32 %v3454_v17, %v2036_v50  ;;  %v4578_v22 = vpop.f32.mrb[6].mxu0 }
 0x238   : > { %v3457_v16 = vpop.f32.mrb[7].mxu0  ;;  %v3536_v3 = vmul.f32 %v4613_v15, %v4613_v15 }
 0x239   : > { %v4128_v52 = vpack.c.bf16 %v4613_v15, %v4614_v18  ;;  %v3520_v6 = vadd.f32 %v4614_v18, %v3519_v37  ;;  %v3535_v10 = vmul.f32 %v4614_v18, %v4614_v18 }
 0x23b   : > { %4140 = vst [vmem:[%s5856_s17 + $0x8] sm:$0xff] %v4128_v52   ;;  %v3542_v27 = vadd.f32 %v3541_v11, %v3535_v10  ;;  %v3521_v28 = vadd.f32 %v4613_v15, %v3520_v6 }
 0x23d   : > { %v4581_v29 = vpop.f32.mrb[8].mxu0  ;;  %v3543_v30 = vadd.f32 %v3542_v27, %v3536_v3 }
 0x23e   : > { %v4615_v31 = vadd.f32 %v4581_v29, %v4421_v41  ;;  %v3468_v32 = vpop.f32.mrb[9].mxu0 }
 0x23f   : > { %v4616_v33 = vadd.f32 %v3468_v32, %v2050_v56  ;;  %v4582_v34 = vpop.f32.mrb[10].mxu0 }
 0x240   : > { %v3471_v26 = vpop.f32.mrb[11].mxu0  ;;  %v3538_v39 = vmul.f32 %v4615_v31, %v4615_v31 }
 0x241   : > { %v4133_v51 = vpack.c.bf16 %v4615_v31, %v4616_v33  ;;  %v3522_v35 = vadd.f32 %v4616_v33, %v3521_v28  ;;  %v3537_v36 = vmul.f32 %v4616_v33, %v4616_v33 }
 0x243   : > { %4141 = vst [vmem:[%s5856_s17 + $0x10] sm:$0xff] %v4133_v51   ;;  %v3544_v40 = vadd.f32 %v3543_v30, %v3537_v36  ;;  %v3523_v42 = vadd.f32 %v4615_v31, %v3522_v35 }
 0x245   : > { %v4585_v20 = vpop.f32.mrb[12].mxu0  ;;  %v3545_v43 = vadd.f32 %v3544_v40, %v3538_v39 }
 0x246   : > { %v4617_v44 = vadd.f32 %v4585_v20, %v5841_v21  ;;  %v3482_v46 = vpop.f32.mrb[13].mxu0 }
 0x247   : > { %v4618_v47 = vadd.f32 %v3482_v46, %v5843_v61  ;;  %v4586_v49 = vpop.f32.mrb[14].mxu0 }
 0x248   : > { %v3485_v62 = vpop.f32.mrb[15].mxu0  ;;  %v3540_v53 = vmul.f32 %v4617_v44, %v4617_v44 }
 0x249   : > { %v4138_v48 = vpack.c.bf16 %v4617_v44, %v4618_v47  ;;  %v3524_v54 = vadd.f32 %v4618_v47, %v3523_v42  ;;  %v3539_v50 = vmul.f32 %v4618_v47, %v4618_v47 }
 0x24b   : > { %4142 = vst [vmem:[%s5856_s17 + $0x18] sm:$0xff] %v4138_v48   ;;  %v3525_v55 = vadd.f32 %v4617_v44, %v3524_v54  ;;  %v3546_v41 = vadd.f32 %v3545_v43, %v3539_v50 }
 0x24c   : > { %5082 = shalt.err (!%p5079_p2)
}
 0x24d   : > { %s5083_s17 = scalar_lea.hbm %s5871_s30, 512  ;;  %s5087_s14 = scalar_lea.hbm %s5988_s5, 1024 }
 0x24e   : > { %p5084_p13 = scmp.ne.s32.totalorder %s5871_s30, %s5083_s17  ;;  %p5088_p4 = scmp.lt.u32.totalorder %s5871_s30, %s5988_s5 }
 0x24f   : > { %p5089_p5 = scmp.lt.u32.totalorder %s5087_s14, %s5083_s17  ;;  %p5091_p11 = scmp.lt.u32.totalorder %s5083_s17, %s5871_s30 }
 0x250   : > { %p5085_p6 = pnand %p5084_p13, %p6009_p0 }
 0x251   : > { %p5090_p8 = por %p5089_p5, %p5088_p4 }
 0x252   : > { %p5086_p10 = pneg %p5085_p6 }
 0x253   : > { %p5092_p1 = por %p5091_p11, %p5090_p8 }
 0x255   : > { %p5093_p3 = pnand %p5092_p1, %p5086_p10 }
 0x257   : > { %5096 = shalt.err (!%p5093_p3)
}
 0x258   : > { %s5210_s22 = smov 64   ;;  %s5211_s10 = smov 4   ;;  %v3526_v56 = vrot.slane %v3525_v55, 4  ;;  %v3547_v57 = vadd.f32 %v3546_v41, %v3540_v53 }
 0x259   : > { %4741 = dma.vmem_to_hbm [thread:$0]  (%p6009_p0), %s5865_s23, 512, %s5871_s30, %s3697_s9, %s5210_s22, %s5210_s22, %s5211_s10  }
 0x25a   : > { %v3527_v58 = vadd.f32 %v3526_v56, %v3525_v55  ;;  %v3548_v21 = vrot.slane %v3547_v57, 4  ;;  %s3915_s17 = sshll.u32 %s5430_s11, 1  ;;  %s3749_s20 = sshll.u32 %s5846_s12, 4  ;;  %s5903_s20 = int_to_ptr.vmem [resolvable:$true] %s3749_s20 }
 0x25b   : > { %s3701_s21 = sand.u32 1, %s5277_s28   ;;  %s4112_s14 = sshll.u32 %s5277_s28, 5 }
 0x25c   : > { %v3528_v61 = vrot.slane %v3527_v58, 2  ;;  %v3549_v63 = vadd.f32 %v3548_v21, %v3547_v57  ;;  %s336_s13 = scalar_lea.vmem [#allocation11], %s3915_s17  ;;  %s4119_s29 = sshll.u32 %s5277_s28, 10 }
 0x25d   : > { %s3736_s15 = sshll.u32 %s336_s13, 4  ;;  %s5908_s11 = scalar_lea.hbm %s5989_s6, %s4112_s14  ;;  %s5910_s15 = int_to_ptr.vmem [resolvable:$true] %s3736_s15 }
 0x25e   : > { %v3529_v60 = vadd.f32 %v3528_v61, %v3527_v58  ;;  %v3550_v0 = vrot.slane %v3549_v63, 2  ;;  %s5915_s28 = scalar_lea.hbm %s5990_s7, %s4119_s29  ;;  %s5917_s22 = scalar_lea.sflag [#allocation12], %s3701_s21 }
 0x25f   : > { %s5097_s10 = scalar_lea.vmem %s5910_s15, 32  ;;  %s5212_s17 = smov [#allocation11]  }
 0x260   : > { %v3530_v59 = vrot.slane %v3529_v60, 1  ;;  %v3551_v14 = vadd.f32 %v3550_v0, %v3549_v63  ;;  %p5098_p7 = scmp.ne.s32.totalorder %s5910_s15, %s5097_s10  ;;  %s5101_s14 = sshll.u32 %s5212_s17, 4  ;;  %s5102_s14 = int_to_ptr.vmem [resolvable:$false] %s5101_s14 }
 0x261   : > { %s5103_s23 = scalar_lea.vmem %s5102_s14, 64  ;;  %p5104_p2 = scmp.lt.s32.totalorder %s5910_s15, %s5102_s14 }
 0x262   : > { %v3531_v13 = vadd.f32 %v3530_v59, %v3529_v60  ;;  %v3552_v1 = vrot.slane %v3551_v14, 1  ;;  %p5099_p9 = pnand %p5098_p7, %p6009_p0  ;;  %p5105_p13 = scmp.lt.s32.totalorder %s5103_s23, %s5097_s10 }
 0x264   : > { %3532 = vst [vmem:[%s336_s13] sm:$0x1] %v3531_v13  ;;  %v3553_v23 = vadd.f32 %v3552_v1, %v3551_v14  ;;  %p5100_p12 = pneg %p5099_p9  ;;  %p5106_p6 = por %p5105_p13, %p5104_p2 }
 0x266   : > { %3554 = vst [vmem:[%s336_s13 + $0x1] sm:$0x1] %v3553_v23  ;;  %p5107_p10 = pnand %p5106_p6, %p5100_p12 }
 0x268   : > { %5110 = shalt.err (!%p5107_p10)
}
 0x269   : > { %s5111_s29 = scalar_lea.hbm %s5908_s11, 32  ;;  %s5115_s30 = scalar_lea.hbm %s5989_s6, 64 }
 0x26a   : > { %p5112_p4 = scmp.ne.s32.totalorder %s5908_s11, %s5111_s29  ;;  %p5116_p11 = scmp.lt.u32.totalorder %s5908_s11, %s5989_s6 }
 0x26b   : > { %p5117_p1 = scmp.lt.u32.totalorder %s5115_s30, %s5111_s29  ;;  %p5119_p7 = scmp.lt.u32.totalorder %s5111_s29, %s5908_s11 }
 0x26c   : > { %p5113_p5 = pnand %p5112_p4, %p6009_p0 }
 0x26d   : > { %p5118_p3 = por %p5117_p1, %p5116_p11 }
 0x26e   : > { %p5114_p8 = pneg %p5113_p5 }
 0x26f   : > { %p5120_p9 = por %p5119_p7, %p5118_p3 }
 0x271   : > { %p5121_p12 = pnand %p5120_p9, %p5114_p8 }
 0x273   : > { %5124 = shalt.err (!%p5121_p12)
}
 0x274   : > { %4742 = dma.vmem_to_hbm [thread:$0]  (%p6009_p0), %s5910_s15, 32, %s5908_s11, %s5917_s22  }
 0x275   : > { %s5125_s10 = scalar_lea.vmem %s5903_s20, 1024  ;;  %s5213_s17 = smov [#allocation13]  }
 0x276   : > { %p5126_p2 = scmp.ne.s32.totalorder %s5903_s20, %s5125_s10  ;;  %s5129_s14 = sshll.u32 %s5213_s17, 4  ;;  %s5130_s14 = int_to_ptr.vmem [resolvable:$false] %s5129_s14 }
 0x277   : > { %s5131_s23 = scalar_lea.vmem %s5130_s14, 2048  ;;  %p5132_p10 = scmp.lt.s32.totalorder %s5903_s20, %s5130_s14 }
 0x278   : > { %p5127_p13 = pnand %p5126_p2, %p6009_p0  ;;  %p5133_p4 = scmp.lt.s32.totalorder %s5131_s23, %s5125_s10 }
 0x27a   : > { %p5128_p6 = pneg %p5127_p13  ;;  %p5134_p5 = por %p5133_p4, %p5132_p10 }
 0x27c   : > { %p5135_p8 = pnand %p5134_p5, %p5128_p6 }
 0x27e   : > { %5138 = shalt.err (!%p5135_p8)
}
 0x27f   : > { %s5139_s15 = scalar_lea.hbm %s5915_s28, 1024  ;;  %s5143_s21 = scalar_lea.hbm %s5990_s7, 2048 }
 0x280   : > { %p5140_p11 = scmp.ne.s32.totalorder %s5915_s28, %s5139_s15  ;;  %p5144_p7 = scmp.lt.u32.totalorder %s5915_s28, %s5990_s7 }
 0x281   : > { %p5145_p9 = scmp.lt.u32.totalorder %s5143_s21, %s5139_s15  ;;  %p5147_p2 = scmp.lt.u32.totalorder %s5139_s15, %s5915_s28 }
 0x282   : > { %p5141_p1 = pnand %p5140_p11, %p6009_p0 }
 0x283   : > { %p5146_p12 = por %p5145_p9, %p5144_p7 }
 0x284   : > { %p5142_p3 = pneg %p5141_p1 }
 0x285   : > { %p5148_p13 = por %p5147_p2, %p5146_p12 }
 0x287   : > { %p5149_p6 = pnand %p5148_p13, %p5142_p3 }
 0x289   : > { %5152 = shalt.err (!%p5149_p6)
}
 0x28a   : > { %s5214_s12 = smov 128   ;;  %s5215_s9 = smov 8  }
 0x28b   : > { %4743 = dma.vmem_to_hbm [thread:$0]  (%p6009_p0), %s5903_s20, 1024, %s5915_s28, %s5917_s22, %s5214_s12, %s5214_s12, %s5215_s9  }
 0x28c PF: > { %s3764_s10 = sand.u32 1, %s5187_s24   ;;  %p6010_p10 = scmp.ne.s32.totalorder %s5996_s8, 0 }
 0x28d   : > { %p6011_p4 = scmp.ge.s32.totalorder %s5199_s27, 2  ;;  %s3765_s17 = scalar_lea.sflag [#allocation6], %s3764_s10 }
 0x28f   : > { %p4759_p5 = pnand %p6011_p4, %p6010_p10 }
 0x291   : > { %5178 = dma.done.wait (!%p4759_p5), %s3765_s17, 512  }
 0x292   : > { %5180 = vsyncadd (!%p4759_p5), %s3765_s17, 4294966784  ;;  %s6012_s14 = sadd.s32 4294967294, %s5199_s27  }
 0x293   : > { %s3773_s23 = sand.u32 1, %s6012_s14  }
 0x294   : > { %s3774_s15 = scalar_lea.sflag [#allocation12], %s3773_s23 }
 0x295   : > { %5182 = dma.done.wait (!%p4759_p5), %s3774_s15, 1056  }
 0x296   : > { %5184 = vsyncadd (!%p4759_p5), %s3774_s15, 4294966240  ;;  %p25_p0 = scmp.ge.s32.totalorder %s5368_s16, 4   ;;  %s6013_s24 = smov %s5191_s25 }
 0x297   : > { %s6014_s25 = smov %s5195_s26  ;;  %s6015_s26 = smov %s5384_s19 }
 0x298   : > { %s6016_s27 = smov %s5368_s16  ;;  %27 = sbr.rel (!%p25_p0) target bundleno = 8 (0x8), region = 133 }
 0x29f   :  { %3788 = vsyncpa [#allocation5], 1 }
 0x2a0   :  { %3790 = vsyncpa [#allocation5 + $0x1], 1 }
 0x2a1   :  { %3791 = vsyncpa [#allocation8], 1 }
 0x2a2   :  { %3792 = vsyncpa [#allocation6], 1 }
 0x2a3   :  { %3794 = vsyncpa [#allocation6 + $0x1], 1 }
 0x2a4   :  { %3795 = vsyncpa [#allocation12], 1 }
 0x2a5   :  { %3797 = vsyncpa [#allocation12 + $0x1], 1 }

</bundles_post_ra>
